<compile_context>
chip_gen: v7x
topology: tpu7x:2x2x1
jax: 0.10.0
libtpu: 0.0.40
codegen_flags: <defaults>
</compile_context>

<pallas_src>
import functools
import math

import jax
import jax.numpy as jnp
from jax import lax
from jax.experimental import pallas as pl
from jax.experimental.pallas import tpu as pltpu

# float32 => bit-exact vs the f32 reference (primary correctness gate).
# Use jnp.bfloat16 for MXU peak on v6e/v7x at large shapes (keep f32 on v5e).
MATMUL_DTYPE = jnp.float32
LANE = 128
VMEM_LIMIT_BYTES = 48 * 1024 * 1024


def _round_up(n, m):
    return ((n + m - 1) // m) * m


# ---------------------------------------------------------------------------
# Kernel 1: per-batch embedding row gather (manual DMA) + QKV projection +
# last-token-only attention + residual.  Grid = (batch,), "parallel".
# ---------------------------------------------------------------------------
def _attn_last_token_kernel(tok_ref, emb_hbm, wq_ref, bq_ref, wk_ref, bk_ref,
                            wv_ref, bv_ref, h_ref, x_buf, dma_sems, *, seq):
    # tok_ref:  (B*S,) int32 in SMEM (scalar prefetch)
    # emb_hbm:  (V, Ep) f32 in HBM (pl.ANY) -- gathered row-by-row via DMA
    # w{q,k,v}: (Ep, Ep)   b{q,k,v}: (1, Ep)   (1/sqrt(E) folded into w_q/b_q)
    # h_ref:    (1, 1, Ep) output block = last-token hidden state of this batch
    # x_buf:    (S, Ep) f32 VMEM scratch, dma_sems: (S,) DMA semaphores
    cdt = MATMUL_DTYPE
    b = pl.program_id(0)
    base = b * seq

    # --- gather the S embedding rows for this batch element ---
    copies = []
    for s in range(seq):
        tok = tok_ref[base + s]
        cp = pltpu.make_async_copy(emb_hbm.at[pl.ds(tok, 1), :],
                                   x_buf.at[pl.ds(s, 1), :],
                                   dma_sems.at[s])
        cp.start()
        copies.append(cp)
    for cp in copies:
        cp.wait()

    x = x_buf[...]                      # (S, Ep) f32
    x_last = x[seq - 1:seq, :]          # (1, Ep) -- only query row the model uses
    xc = x.astype(cdt)

    # Last-token-only Q; full K/V (needed for the attention context).
    q = jnp.dot(x_last.astype(cdt), wq_ref[...].astype(cdt),
                preferred_element_type=jnp.float32) + bq_ref[...]        # (1, Ep)
    k = jnp.dot(xc, wk_ref[...].astype(cdt),
                preferred_element_type=jnp.float32) + bk_ref[...]        # (S, Ep)
    v = jnp.dot(xc, wv_ref[...].astype(cdt),
                preferred_element_type=jnp.float32) + bv_ref[...]        # (S, Ep)

    # q @ k^T as an NT contraction (MXU trans_b; no explicit XLU transpose).
    logits = lax.dot_general(q.astype(cdt), k.astype(cdt),
                             (((1,), (1,)), ((), ())),
                             preferred_element_type=jnp.float32)         # (1, S)

    # f32 softmax with exact reciprocal (tiny, off the critical path).
    m = jnp.max(logits, axis=-1, keepdims=True)
    p = jnp.exp(logits - m)
    attn = p / jnp.sum(p, axis=-1, keepdims=True)

    out = jnp.dot(attn.astype(cdt), v.astype(cdt),
                  preferred_element_type=jnp.float32)                    # (1, Ep)
    h = out + x_last                                                     # residual, f32
    h_ref[0] = h.astype(h_ref.dtype)
    # TODO(synk): return_attn=True path (full (B,S,S) attention map) not
    # implemented; it would require the full-Q attention instead of this
    # last-token-only optimization.


# ---------------------------------------------------------------------------
# Kernel 2: last-token output projection, tiled over the padded vocab dim.
# Grid = (Vp // tn,), "parallel" (sharded across both TCs on v7x).
# ---------------------------------------------------------------------------
def _out_proj_kernel(h_ref, w_ref, b_ref, o_ref):
    cdt = MATMUL_DTYPE
    o_ref[...] = (jnp.dot(h_ref[...].astype(cdt), w_ref[...].astype(cdt),
                          preferred_element_type=jnp.float32)
                  + b_ref[...]).astype(o_ref.dtype)


def transformer_forward(tokens, emb, w_qkv, b_qkv, w_out, b_out, *, vocab_tile=512):
    """tokens: (B, S) int32. Returns (B, vocab) float32 last-token logits."""
    B, S = tokens.shape
    V, E = emb.shape
    assert w_qkv.shape == (E, 3 * E) and w_out.shape == (E, V)

    scale = 1.0 / math.sqrt(E)
    Ep = _round_up(E, LANE)
    Vp = _round_up(V, LANE)
    tn = math.gcd(Vp, _round_up(vocab_tile, LANE))   # lane-multiple tile dividing Vp

    def pad_w(w):  # (E, E) -> (Ep, Ep), zero padded (numerically exact)
        return jnp.pad(w, ((0, Ep - E), (0, Ep - E)))

    def pad_b(bvec):  # (E,) -> (1, Ep)
        return jnp.pad(bvec, (0, Ep - E)).reshape(1, Ep)

    # Pre-split QKV weights (no in-kernel non-aligned lane slicing); fold the
    # attention scale into the q projection.
    w_q = pad_w(w_qkv[:, 0:E] * scale)
    w_k = pad_w(w_qkv[:, E:2 * E])
    w_v = pad_w(w_qkv[:, 2 * E:3 * E])
    b_q = pad_b(b_qkv[0:E] * scale)
    b_k = pad_b(b_qkv[E:2 * E])
    b_v = pad_b(b_qkv[2 * E:3 * E])

    emb_p = jnp.pad(emb, ((0, 0), (0, Ep - E)))                       # (V, Ep)
    w_out_p = jnp.pad(w_out, ((0, Ep - E), (0, Vp - V)))              # (Ep, Vp)
    b_out_p = jnp.pad(b_out, (0, Vp - V)).reshape(1, Vp)              # (1, Vp)

    tok_flat = tokens.reshape(B * S).astype(jnp.int32)

    # --- kernel 1: last-token hidden state, one grid step per batch element ---
    h3 = pl.pallas_call(
        functools.partial(_attn_last_token_kernel, seq=S),
        out_shape=jax.ShapeDtypeStruct((B, 1, Ep), jnp.float32),
        grid_spec=pltpu.PrefetchScalarGridSpec(
            num_scalar_prefetch=1,
            grid=(B,),
            in_specs=[
                pl.BlockSpec(memory_space=pl.ANY),                    # emb table (HBM)
                pl.BlockSpec((Ep, Ep), lambda b, tok: (0, 0)),        # w_q
                pl.BlockSpec((1, Ep), lambda b, tok: (0, 0)),         # b_q
                pl.BlockSpec((Ep, Ep), lambda b, tok: (0, 0)),        # w_k
                pl.BlockSpec((1, Ep), lambda b, tok: (0, 0)),         # b_k
                pl.BlockSpec((Ep, Ep), lambda b, tok: (0, 0)),        # w_v
                pl.BlockSpec((1, Ep), lambda b, tok: (0, 0)),         # b_v
            ],
            out_specs=pl.BlockSpec((1, 1, Ep), lambda b, tok: (b, 0, 0)),
            scratch_shapes=[pltpu.VMEM((S, Ep), jnp.float32),
                            pltpu.SemaphoreType.DMA((S,))]),
        compiler_params=pltpu.CompilerParams(
            dimension_semantics=("parallel",),
            vmem_limit_bytes=VMEM_LIMIT_BYTES),
    )(tok_flat, emb_p, w_q, b_q, w_k, b_k, w_v, b_v)
    h = h3.reshape(B, Ep)

    # --- kernel 2: (B, Ep) @ (Ep, Vp) output projection, vocab-tiled ---
    out_p = pl.pallas_call(
        _out_proj_kernel,
        out_shape=jax.ShapeDtypeStruct((B, Vp), jnp.float32),
        grid=(Vp // tn,),
        in_specs=[pl.BlockSpec((B, Ep), lambda j: (0, 0)),
                  pl.BlockSpec((Ep, tn), lambda j: (0, j)),
                  pl.BlockSpec((1, tn), lambda j: (0, j))],
        out_specs=pl.BlockSpec((B, tn), lambda j: (0, j)),
        compiler_params=pltpu.CompilerParams(
            dimension_semantics=("parallel",),
            vmem_limit_bytes=VMEM_LIMIT_BYTES),
    )(h, w_out_p, b_out_p)

    return out_p[:, :V]


def _reference_forward(tokens, emb, w_qkv, b_qkv, w_out, b_out):
    # Pure-JAX f32 reference mirroring the PyTorch module.
    x = jnp.take(emb, tokens, axis=0)
    E = x.shape[-1]
    qkv = x @ w_qkv + b_qkv
    q, k, v = qkv[..., 0:E], qkv[..., E:2 * E], qkv[..., 2 * E:3 * E]
    logits = (q @ jnp.swapaxes(k, -2, -1)) / math.sqrt(E)
    attn = jax.nn.softmax(logits, axis=-1)
    out = attn @ v
    x = out + x
    return (x @ w_out + b_out)[:, -1, :]


if __name__ == "__main__":
    # Small, forward-consistent shapes: batch, seq, embed_dim, vocab (DICTIONARY_SIZE).
    B, S, E, V = 2, 8, 32, 64

    key = jax.random.PRNGKey(0)
    k_tok, k_emb, k_wq, k_bq, k_wo, k_bo = jax.random.split(key, 6)

    tokens = jax.random.randint(k_tok, (B, S), 0, V, dtype=jnp.int32)

    emb = jax.random.normal(k_emb, (V, E), dtype=jnp.float32)                  # nn.Embedding(V, E)
    w_qkv = jax.random.normal(k_wq, (E, 3 * E), dtype=jnp.float32) * (1.0 / math.sqrt(E))
    b_qkv = jax.random.normal(k_bq, (3 * E,), dtype=jnp.float32) * 0.02
    w_out = jax.random.normal(k_wo, (E, V), dtype=jnp.float32) * (1.0 / math.sqrt(E))
    b_out = jax.random.normal(k_bo, (V,), dtype=jnp.float32) * 0.02

    result = transformer_forward(tokens, emb, w_qkv, b_qkv, w_out, b_out)
    result = jax.block_until_ready(result)

    ref = _reference_forward(tokens, emb, w_qkv, b_qkv, w_out, b_out)
    assert result.shape == (B, V)

    # Note: out-of-range tokens (>= V) would read a different row than
    # jnp.take's clamping in the reference -- only valid inputs are supported.
    tol = 1e-4 if MATMUL_DTYPE == jnp.float32 else 5e-2
    assert jnp.allclose(result, ref, atol=tol, rtol=tol), "mismatch vs reference"

    print("KERNEL_OK")
</pallas_src>

<mosaic_0001>
module attributes {stable_mosaic.version = 11 : i64} {
  func.func @_attn_last_token_kernel(%arg0: i32, %arg1: memref<16xi32, #tpu.memory_space<smem>>, %arg2: memref<64x128xf32, #tpu.memory_space<any>>, %arg3: memref<128x128xf32, #tpu.memory_space<vmem>>, %arg4: memref<1x128xf32, #tpu.memory_space<vmem>>, %arg5: memref<128x128xf32, #tpu.memory_space<vmem>>, %arg6: memref<1x128xf32, #tpu.memory_space<vmem>>, %arg7: memref<128x128xf32, #tpu.memory_space<vmem>>, %arg8: memref<1x128xf32, #tpu.memory_space<vmem>>, %arg9: memref<1x1x128xf32, #tpu.memory_space<vmem>>, %arg10: memref<8x128xf32, #tpu.memory_space<vmem>>, %arg11: memref<8x!tpu.dma_semaphore, #tpu.memory_space<semaphore_mem>>) attributes {dimension_semantics = [#tpu.dimension_semantics<parallel>], iteration_bounds = array<i64: 2>, scalar_prefetch = 1 : i64, scratch_operands = 2 : i64, tpu.core_type = #tpu.core_type<tc>, window_params = [{}, {pipeline_mode = #tpu.pipeline_mode<synchronous>, transform_indices = @transform_1, window_bounds = array<i64: 128, 128>}, {pipeline_mode = #tpu.pipeline_mode<synchronous>, transform_indices = @transform_2, window_bounds = array<i64: 1, 128>}, {pipeline_mode = #tpu.pipeline_mode<synchronous>, transform_indices = @transform_3, window_bounds = array<i64: 128, 128>}, {pipeline_mode = #tpu.pipeline_mode<synchronous>, transform_indices = @transform_4, window_bounds = array<i64: 1, 128>}, {pipeline_mode = #tpu.pipeline_mode<synchronous>, transform_indices = @transform_5, window_bounds = array<i64: 128, 128>}, {pipeline_mode = #tpu.pipeline_mode<synchronous>, transform_indices = @transform_6, window_bounds = array<i64: 1, 128>}, {transform_indices = @transform_7, window_bounds = array<i64: 1, 1, 128>}]} {
    %c8_i32 = arith.constant 8 : i32
    %0 = arith.muli %arg0, %c8_i32 : i32
    %c0_i32 = arith.constant 0 : i32
    %1 = arith.addi %0, %c0_i32 : i32
    %2 = arith.index_cast %1 : i32 to index
    %3 = memref.load %arg1[%2] : memref<16xi32, #tpu.memory_space<smem>>
    %c0_i32_0 = arith.constant 0 : i32
    %c0_i32_1 = arith.constant 0 : i32
    %4 = tpu.memref_slice %arg2[%3, %c0_i32_1] : memref<64x128xf32, #tpu.memory_space<any>> -> memref<1x128xf32, #tpu.memory_space<any>>
    %c0_i32_2 = arith.constant 0 : i32
    %c0_i32_3 = arith.constant 0 : i32
    %5 = tpu.memref_slice %arg10[%c0_i32_2, %c0_i32_3] : memref<8x128xf32, #tpu.memory_space<vmem>> -> memref<1x128xf32, #tpu.memory_space<vmem>>
    %6 = tpu.memref_slice %arg11[%c0_i32_0] : memref<8x!tpu.dma_semaphore, #tpu.memory_space<semaphore_mem>> -> memref<1x!tpu.dma_semaphore, #tpu.memory_space<semaphore_mem>>
    %7 = tpu.memref_squeeze %6 : memref<1x!tpu.dma_semaphore, #tpu.memory_space<semaphore_mem>> -> memref<!tpu.dma_semaphore, #tpu.memory_space<semaphore_mem>>
    tpu.enqueue_dma source(%4 : memref<1x128xf32, #tpu.memory_space<any>>) target(%5 : memref<1x128xf32, #tpu.memory_space<vmem>>) target_semaphore(%7 : memref<!tpu.dma_semaphore, #tpu.memory_space<semaphore_mem>>)
    %c1_i32 = arith.constant 1 : i32
    %8 = arith.addi %0, %c1_i32 : i32
    %9 = arith.index_cast %8 : i32 to index
    %10 = memref.load %arg1[%9] : memref<16xi32, #tpu.memory_space<smem>>
    %c1_i32_4 = arith.constant 1 : i32
    %c0_i32_5 = arith.constant 0 : i32
    %11 = tpu.memref_slice %arg2[%10, %c0_i32_5] : memref<64x128xf32, #tpu.memory_space<any>> -> memref<1x128xf32, #tpu.memory_space<any>>
    %c1_i32_6 = arith.constant 1 : i32
    %c0_i32_7 = arith.constant 0 : i32
    %12 = tpu.memref_slice %arg10[%c1_i32_6, %c0_i32_7] : memref<8x128xf32, #tpu.memory_space<vmem>> -> memref<1x128xf32, #tpu.memory_space<vmem>>
    %13 = tpu.memref_slice %arg11[%c1_i32_4] : memref<8x!tpu.dma_semaphore, #tpu.memory_space<semaphore_mem>> -> memref<1x!tpu.dma_semaphore, #tpu.memory_space<semaphore_mem>>
    %14 = tpu.memref_squeeze %13 : memref<1x!tpu.dma_semaphore, #tpu.memory_space<semaphore_mem>> -> memref<!tpu.dma_semaphore, #tpu.memory_space<semaphore_mem>>
    tpu.enqueue_dma source(%11 : memref<1x128xf32, #tpu.memory_space<any>>) target(%12 : memref<1x128xf32, #tpu.memory_space<vmem>>) target_semaphore(%14 : memref<!tpu.dma_semaphore, #tpu.memory_space<semaphore_mem>>)
    %c2_i32 = arith.constant 2 : i32
    %15 = arith.addi %0, %c2_i32 : i32
    %16 = arith.index_cast %15 : i32 to index
    %17 = memref.load %arg1[%16] : memref<16xi32, #tpu.memory_space<smem>>
    %c2_i32_8 = arith.constant 2 : i32
    %c0_i32_9 = arith.constant 0 : i32
    %18 = tpu.memref_slice %arg2[%17, %c0_i32_9] : memref<64x128xf32, #tpu.memory_space<any>> -> memref<1x128xf32, #tpu.memory_space<any>>
    %c2_i32_10 = arith.constant 2 : i32
    %c0_i32_11 = arith.constant 0 : i32
    %19 = tpu.memref_slice %arg10[%c2_i32_10, %c0_i32_11] : memref<8x128xf32, #tpu.memory_space<vmem>> -> memref<1x128xf32, #tpu.memory_space<vmem>>
    %20 = tpu.memref_slice %arg11[%c2_i32_8] : memref<8x!tpu.dma_semaphore, #tpu.memory_space<semaphore_mem>> -> memref<1x!tpu.dma_semaphore, #tpu.memory_space<semaphore_mem>>
    %21 = tpu.memref_squeeze %20 : memref<1x!tpu.dma_semaphore, #tpu.memory_space<semaphore_mem>> -> memref<!tpu.dma_semaphore, #tpu.memory_space<semaphore_mem>>
    tpu.enqueue_dma source(%18 : memref<1x128xf32, #tpu.memory_space<any>>) target(%19 : memref<1x128xf32, #tpu.memory_space<vmem>>) target_semaphore(%21 : memref<!tpu.dma_semaphore, #tpu.memory_space<semaphore_mem>>)
    %c3_i32 = arith.constant 3 : i32
    %22 = arith.addi %0, %c3_i32 : i32
    %23 = arith.index_cast %22 : i32 to index
    %24 = memref.load %arg1[%23] : memref<16xi32, #tpu.memory_space<smem>>
    %c3_i32_12 = arith.constant 3 : i32
    %c0_i32_13 = arith.constant 0 : i32
    %25 = tpu.memref_slice %arg2[%24, %c0_i32_13] : memref<64x128xf32, #tpu.memory_space<any>> -> memref<1x128xf32, #tpu.memory_space<any>>
    %c3_i32_14 = arith.constant 3 : i32
    %c0_i32_15 = arith.constant 0 : i32
    %26 = tpu.memref_slice %arg10[%c3_i32_14, %c0_i32_15] : memref<8x128xf32, #tpu.memory_space<vmem>> -> memref<1x128xf32, #tpu.memory_space<vmem>>
    %27 = tpu.memref_slice %arg11[%c3_i32_12] : memref<8x!tpu.dma_semaphore, #tpu.memory_space<semaphore_mem>> -> memref<1x!tpu.dma_semaphore, #tpu.memory_space<semaphore_mem>>
    %28 = tpu.memref_squeeze %27 : memref<1x!tpu.dma_semaphore, #tpu.memory_space<semaphore_mem>> -> memref<!tpu.dma_semaphore, #tpu.memory_space<semaphore_mem>>
    tpu.enqueue_dma source(%25 : memref<1x128xf32, #tpu.memory_space<any>>) target(%26 : memref<1x128xf32, #tpu.memory_space<vmem>>) target_semaphore(%28 : memref<!tpu.dma_semaphore, #tpu.memory_space<semaphore_mem>>)
    %c4_i32 = arith.constant 4 : i32
    %29 = arith.addi %0, %c4_i32 : i32
    %30 = arith.index_cast %29 : i32 to index
    %31 = memref.load %arg1[%30] : memref<16xi32, #tpu.memory_space<smem>>
    %c4_i32_16 = arith.constant 4 : i32
    %c0_i32_17 = arith.constant 0 : i32
    %32 = tpu.memref_slice %arg2[%31, %c0_i32_17] : memref<64x128xf32, #tpu.memory_space<any>> -> memref<1x128xf32, #tpu.memory_space<any>>
    %c4_i32_18 = arith.constant 4 : i32
    %c0_i32_19 = arith.constant 0 : i32
    %33 = tpu.memref_slice %arg10[%c4_i32_18, %c0_i32_19] : memref<8x128xf32, #tpu.memory_space<vmem>> -> memref<1x128xf32, #tpu.memory_space<vmem>>
    %34 = tpu.memref_slice %arg11[%c4_i32_16] : memref<8x!tpu.dma_semaphore, #tpu.memory_space<semaphore_mem>> -> memref<1x!tpu.dma_semaphore, #tpu.memory_space<semaphore_mem>>
    %35 = tpu.memref_squeeze %34 : memref<1x!tpu.dma_semaphore, #tpu.memory_space<semaphore_mem>> -> memref<!tpu.dma_semaphore, #tpu.memory_space<semaphore_mem>>
    tpu.enqueue_dma source(%32 : memref<1x128xf32, #tpu.memory_space<any>>) target(%33 : memref<1x128xf32, #tpu.memory_space<vmem>>) target_semaphore(%35 : memref<!tpu.dma_semaphore, #tpu.memory_space<semaphore_mem>>)
    %c5_i32 = arith.constant 5 : i32
    %36 = arith.addi %0, %c5_i32 : i32
    %37 = arith.index_cast %36 : i32 to index
    %38 = memref.load %arg1[%37] : memref<16xi32, #tpu.memory_space<smem>>
    %c5_i32_20 = arith.constant 5 : i32
    %c0_i32_21 = arith.constant 0 : i32
    %39 = tpu.memref_slice %arg2[%38, %c0_i32_21] : memref<64x128xf32, #tpu.memory_space<any>> -> memref<1x128xf32, #tpu.memory_space<any>>
    %c5_i32_22 = arith.constant 5 : i32
    %c0_i32_23 = arith.constant 0 : i32
    %40 = tpu.memref_slice %arg10[%c5_i32_22, %c0_i32_23] : memref<8x128xf32, #tpu.memory_space<vmem>> -> memref<1x128xf32, #tpu.memory_space<vmem>>
    %41 = tpu.memref_slice %arg11[%c5_i32_20] : memref<8x!tpu.dma_semaphore, #tpu.memory_space<semaphore_mem>> -> memref<1x!tpu.dma_semaphore, #tpu.memory_space<semaphore_mem>>
    %42 = tpu.memref_squeeze %41 : memref<1x!tpu.dma_semaphore, #tpu.memory_space<semaphore_mem>> -> memref<!tpu.dma_semaphore, #tpu.memory_space<semaphore_mem>>
    tpu.enqueue_dma source(%39 : memref<1x128xf32, #tpu.memory_space<any>>) target(%40 : memref<1x128xf32, #tpu.memory_space<vmem>>) target_semaphore(%42 : memref<!tpu.dma_semaphore, #tpu.memory_space<semaphore_mem>>)
    %c6_i32 = arith.constant 6 : i32
    %43 = arith.addi %0, %c6_i32 : i32
    %44 = arith.index_cast %43 : i32 to index
    %45 = memref.load %arg1[%44] : memref<16xi32, #tpu.memory_space<smem>>
    %c6_i32_24 = arith.constant 6 : i32
    %c0_i32_25 = arith.constant 0 : i32
    %46 = tpu.memref_slice %arg2[%45, %c0_i32_25] : memref<64x128xf32, #tpu.memory_space<any>> -> memref<1x128xf32, #tpu.memory_space<any>>
    %c6_i32_26 = arith.constant 6 : i32
    %c0_i32_27 = arith.constant 0 : i32
    %47 = tpu.memref_slice %arg10[%c6_i32_26, %c0_i32_27] : memref<8x128xf32, #tpu.memory_space<vmem>> -> memref<1x128xf32, #tpu.memory_space<vmem>>
    %48 = tpu.memref_slice %arg11[%c6_i32_24] : memref<8x!tpu.dma_semaphore, #tpu.memory_space<semaphore_mem>> -> memref<1x!tpu.dma_semaphore, #tpu.memory_space<semaphore_mem>>
    %49 = tpu.memref_squeeze %48 : memref<1x!tpu.dma_semaphore, #tpu.memory_space<semaphore_mem>> -> memref<!tpu.dma_semaphore, #tpu.memory_space<semaphore_mem>>
    tpu.enqueue_dma source(%46 : memref<1x128xf32, #tpu.memory_space<any>>) target(%47 : memref<1x128xf32, #tpu.memory_space<vmem>>) target_semaphore(%49 : memref<!tpu.dma_semaphore, #tpu.memory_space<semaphore_mem>>)
    %c7_i32 = arith.constant 7 : i32
    %50 = arith.addi %0, %c7_i32 : i32
    %51 = arith.index_cast %50 : i32 to index
    %52 = memref.load %arg1[%51] : memref<16xi32, #tpu.memory_space<smem>>
    %c7_i32_28 = arith.constant 7 : i32
    %c0_i32_29 = arith.constant 0 : i32
    %53 = tpu.memref_slice %arg2[%52, %c0_i32_29] : memref<64x128xf32, #tpu.memory_space<any>> -> memref<1x128xf32, #tpu.memory_space<any>>
    %c7_i32_30 = arith.constant 7 : i32
    %c0_i32_31 = arith.constant 0 : i32
    %54 = tpu.memref_slice %arg10[%c7_i32_30, %c0_i32_31] : memref<8x128xf32, #tpu.memory_space<vmem>> -> memref<1x128xf32, #tpu.memory_space<vmem>>
    %55 = tpu.memref_slice %arg11[%c7_i32_28] : memref<8x!tpu.dma_semaphore, #tpu.memory_space<semaphore_mem>> -> memref<1x!tpu.dma_semaphore, #tpu.memory_space<semaphore_mem>>
    %56 = tpu.memref_squeeze %55 : memref<1x!tpu.dma_semaphore, #tpu.memory_space<semaphore_mem>> -> memref<!tpu.dma_semaphore, #tpu.memory_space<semaphore_mem>>
    tpu.enqueue_dma source(%53 : memref<1x128xf32, #tpu.memory_space<any>>) target(%54 : memref<1x128xf32, #tpu.memory_space<vmem>>) target_semaphore(%56 : memref<!tpu.dma_semaphore, #tpu.memory_space<semaphore_mem>>)
    %c0_i32_32 = arith.constant 0 : i32
    %c0_i32_33 = arith.constant 0 : i32
    %57 = tpu.memref_slice %arg2[%3, %c0_i32_33] : memref<64x128xf32, #tpu.memory_space<any>> -> memref<1x128xf32, #tpu.memory_space<any>>
    %c0_i32_34 = arith.constant 0 : i32
    %c0_i32_35 = arith.constant 0 : i32
    %58 = tpu.memref_slice %arg10[%c0_i32_34, %c0_i32_35] : memref<8x128xf32, #tpu.memory_space<vmem>> -> memref<1x128xf32, #tpu.memory_space<vmem>>
    %59 = tpu.memref_slice %arg11[%c0_i32_32] : memref<8x!tpu.dma_semaphore, #tpu.memory_space<semaphore_mem>> -> memref<1x!tpu.dma_semaphore, #tpu.memory_space<semaphore_mem>>
    %60 = tpu.memref_squeeze %59 : memref<1x!tpu.dma_semaphore, #tpu.memory_space<semaphore_mem>> -> memref<!tpu.dma_semaphore, #tpu.memory_space<semaphore_mem>>
    tpu.wait_dma2 semaphore(%60 : memref<!tpu.dma_semaphore, #tpu.memory_space<semaphore_mem>>) src(%57 : memref<1x128xf32, #tpu.memory_space<any>>) dst(%58 : memref<1x128xf32, #tpu.memory_space<vmem>>)
    %c1_i32_36 = arith.constant 1 : i32
    %c0_i32_37 = arith.constant 0 : i32
    %61 = tpu.memref_slice %arg2[%10, %c0_i32_37] : memref<64x128xf32, #tpu.memory_space<any>> -> memref<1x128xf32, #tpu.memory_space<any>>
    %c1_i32_38 = arith.constant 1 : i32
    %c0_i32_39 = arith.constant 0 : i32
    %62 = tpu.memref_slice %arg10[%c1_i32_38, %c0_i32_39] : memref<8x128xf32, #tpu.memory_space<vmem>> -> memref<1x128xf32, #tpu.memory_space<vmem>>
    %63 = tpu.memref_slice %arg11[%c1_i32_36] : memref<8x!tpu.dma_semaphore, #tpu.memory_space<semaphore_mem>> -> memref<1x!tpu.dma_semaphore, #tpu.memory_space<semaphore_mem>>
    %64 = tpu.memref_squeeze %63 : memref<1x!tpu.dma_semaphore, #tpu.memory_space<semaphore_mem>> -> memref<!tpu.dma_semaphore, #tpu.memory_space<semaphore_mem>>
    tpu.wait_dma2 semaphore(%64 : memref<!tpu.dma_semaphore, #tpu.memory_space<semaphore_mem>>) src(%61 : memref<1x128xf32, #tpu.memory_space<any>>) dst(%62 : memref<1x128xf32, #tpu.memory_space<vmem>>)
    %c2_i32_40 = arith.constant 2 : i32
    %c0_i32_41 = arith.constant 0 : i32
    %65 = tpu.memref_slice %arg2[%17, %c0_i32_41] : memref<64x128xf32, #tpu.memory_space<any>> -> memref<1x128xf32, #tpu.memory_space<any>>
    %c2_i32_42 = arith.constant 2 : i32
    %c0_i32_43 = arith.constant 0 : i32
    %66 = tpu.memref_slice %arg10[%c2_i32_42, %c0_i32_43] : memref<8x128xf32, #tpu.memory_space<vmem>> -> memref<1x128xf32, #tpu.memory_space<vmem>>
    %67 = tpu.memref_slice %arg11[%c2_i32_40] : memref<8x!tpu.dma_semaphore, #tpu.memory_space<semaphore_mem>> -> memref<1x!tpu.dma_semaphore, #tpu.memory_space<semaphore_mem>>
    %68 = tpu.memref_squeeze %67 : memref<1x!tpu.dma_semaphore, #tpu.memory_space<semaphore_mem>> -> memref<!tpu.dma_semaphore, #tpu.memory_space<semaphore_mem>>
    tpu.wait_dma2 semaphore(%68 : memref<!tpu.dma_semaphore, #tpu.memory_space<semaphore_mem>>) src(%65 : memref<1x128xf32, #tpu.memory_space<any>>) dst(%66 : memref<1x128xf32, #tpu.memory_space<vmem>>)
    %c3_i32_44 = arith.constant 3 : i32
    %c0_i32_45 = arith.constant 0 : i32
    %69 = tpu.memref_slice %arg2[%24, %c0_i32_45] : memref<64x128xf32, #tpu.memory_space<any>> -> memref<1x128xf32, #tpu.memory_space<any>>
    %c3_i32_46 = arith.constant 3 : i32
    %c0_i32_47 = arith.constant 0 : i32
    %70 = tpu.memref_slice %arg10[%c3_i32_46, %c0_i32_47] : memref<8x128xf32, #tpu.memory_space<vmem>> -> memref<1x128xf32, #tpu.memory_space<vmem>>
    %71 = tpu.memref_slice %arg11[%c3_i32_44] : memref<8x!tpu.dma_semaphore, #tpu.memory_space<semaphore_mem>> -> memref<1x!tpu.dma_semaphore, #tpu.memory_space<semaphore_mem>>
    %72 = tpu.memref_squeeze %71 : memref<1x!tpu.dma_semaphore, #tpu.memory_space<semaphore_mem>> -> memref<!tpu.dma_semaphore, #tpu.memory_space<semaphore_mem>>
    tpu.wait_dma2 semaphore(%72 : memref<!tpu.dma_semaphore, #tpu.memory_space<semaphore_mem>>) src(%69 : memref<1x128xf32, #tpu.memory_space<any>>) dst(%70 : memref<1x128xf32, #tpu.memory_space<vmem>>)
    %c4_i32_48 = arith.constant 4 : i32
    %c0_i32_49 = arith.constant 0 : i32
    %73 = tpu.memref_slice %arg2[%31, %c0_i32_49] : memref<64x128xf32, #tpu.memory_space<any>> -> memref<1x128xf32, #tpu.memory_space<any>>
    %c4_i32_50 = arith.constant 4 : i32
    %c0_i32_51 = arith.constant 0 : i32
    %74 = tpu.memref_slice %arg10[%c4_i32_50, %c0_i32_51] : memref<8x128xf32, #tpu.memory_space<vmem>> -> memref<1x128xf32, #tpu.memory_space<vmem>>
    %75 = tpu.memref_slice %arg11[%c4_i32_48] : memref<8x!tpu.dma_semaphore, #tpu.memory_space<semaphore_mem>> -> memref<1x!tpu.dma_semaphore, #tpu.memory_space<semaphore_mem>>
    %76 = tpu.memref_squeeze %75 : memref<1x!tpu.dma_semaphore, #tpu.memory_space<semaphore_mem>> -> memref<!tpu.dma_semaphore, #tpu.memory_space<semaphore_mem>>
    tpu.wait_dma2 semaphore(%76 : memref<!tpu.dma_semaphore, #tpu.memory_space<semaphore_mem>>) src(%73 : memref<1x128xf32, #tpu.memory_space<any>>) dst(%74 : memref<1x128xf32, #tpu.memory_space<vmem>>)
    %c5_i32_52 = arith.constant 5 : i32
    %c0_i32_53 = arith.constant 0 : i32
    %77 = tpu.memref_slice %arg2[%38, %c0_i32_53] : memref<64x128xf32, #tpu.memory_space<any>> -> memref<1x128xf32, #tpu.memory_space<any>>
    %c5_i32_54 = arith.constant 5 : i32
    %c0_i32_55 = arith.constant 0 : i32
    %78 = tpu.memref_slice %arg10[%c5_i32_54, %c0_i32_55] : memref<8x128xf32, #tpu.memory_space<vmem>> -> memref<1x128xf32, #tpu.memory_space<vmem>>
    %79 = tpu.memref_slice %arg11[%c5_i32_52] : memref<8x!tpu.dma_semaphore, #tpu.memory_space<semaphore_mem>> -> memref<1x!tpu.dma_semaphore, #tpu.memory_space<semaphore_mem>>
    %80 = tpu.memref_squeeze %79 : memref<1x!tpu.dma_semaphore, #tpu.memory_space<semaphore_mem>> -> memref<!tpu.dma_semaphore, #tpu.memory_space<semaphore_mem>>
    tpu.wait_dma2 semaphore(%80 : memref<!tpu.dma_semaphore, #tpu.memory_space<semaphore_mem>>) src(%77 : memref<1x128xf32, #tpu.memory_space<any>>) dst(%78 : memref<1x128xf32, #tpu.memory_space<vmem>>)
    %c6_i32_56 = arith.constant 6 : i32
    %c0_i32_57 = arith.constant 0 : i32
    %81 = tpu.memref_slice %arg2[%45, %c0_i32_57] : memref<64x128xf32, #tpu.memory_space<any>> -> memref<1x128xf32, #tpu.memory_space<any>>
    %c6_i32_58 = arith.constant 6 : i32
    %c0_i32_59 = arith.constant 0 : i32
    %82 = tpu.memref_slice %arg10[%c6_i32_58, %c0_i32_59] : memref<8x128xf32, #tpu.memory_space<vmem>> -> memref<1x128xf32, #tpu.memory_space<vmem>>
    %83 = tpu.memref_slice %arg11[%c6_i32_56] : memref<8x!tpu.dma_semaphore, #tpu.memory_space<semaphore_mem>> -> memref<1x!tpu.dma_semaphore, #tpu.memory_space<semaphore_mem>>
    %84 = tpu.memref_squeeze %83 : memref<1x!tpu.dma_semaphore, #tpu.memory_space<semaphore_mem>> -> memref<!tpu.dma_semaphore, #tpu.memory_space<semaphore_mem>>
    tpu.wait_dma2 semaphore(%84 : memref<!tpu.dma_semaphore, #tpu.memory_space<semaphore_mem>>) src(%81 : memref<1x128xf32, #tpu.memory_space<any>>) dst(%82 : memref<1x128xf32, #tpu.memory_space<vmem>>)
    %c7_i32_60 = arith.constant 7 : i32
    %c0_i32_61 = arith.constant 0 : i32
    %85 = tpu.memref_slice %arg2[%52, %c0_i32_61] : memref<64x128xf32, #tpu.memory_space<any>> -> memref<1x128xf32, #tpu.memory_space<any>>
    %c7_i32_62 = arith.constant 7 : i32
    %c0_i32_63 = arith.constant 0 : i32
    %86 = tpu.memref_slice %arg10[%c7_i32_62, %c0_i32_63] : memref<8x128xf32, #tpu.memory_space<vmem>> -> memref<1x128xf32, #tpu.memory_space<vmem>>
    %87 = tpu.memref_slice %arg11[%c7_i32_60] : memref<8x!tpu.dma_semaphore, #tpu.memory_space<semaphore_mem>> -> memref<1x!tpu.dma_semaphore, #tpu.memory_space<semaphore_mem>>
    %88 = tpu.memref_squeeze %87 : memref<1x!tpu.dma_semaphore, #tpu.memory_space<semaphore_mem>> -> memref<!tpu.dma_semaphore, #tpu.memory_space<semaphore_mem>>
    tpu.wait_dma2 semaphore(%88 : memref<!tpu.dma_semaphore, #tpu.memory_space<semaphore_mem>>) src(%85 : memref<1x128xf32, #tpu.memory_space<any>>) dst(%86 : memref<1x128xf32, #tpu.memory_space<vmem>>)
    %c0 = arith.constant 0 : index
    %c0_64 = arith.constant 0 : index
    %89 = vector.load %arg10[%c0, %c0_64] : memref<8x128xf32, #tpu.memory_space<vmem>>, vector<8x128xf32>
    %90 = vector.extract_strided_slice %89 {offsets = [7, 0], sizes = [1, 128], strides = [1, 1]} : vector<8x128xf32> to vector<1x128xf32>
    %c0_65 = arith.constant 0 : index
    %c0_66 = arith.constant 0 : index
    %91 = vector.load %arg3[%c0_65, %c0_66] : memref<128x128xf32, #tpu.memory_space<vmem>>, vector<128x128xf32>
    %cst = arith.constant dense<0.000000e+00> : vector<1x128xf32>
    %92 = tpu.matmul %90, %91, %cst {dimension_numbers = #tpu.dot_dimension_numbers<[1], [0], [0], [1], [0, 0, 1, 1], [], []>} : vector<1x128xf32>, vector<128x128xf32>, vector<1x128xf32> -> vector<1x128xf32>
    %c0_67 = arith.constant 0 : index
    %c0_68 = arith.constant 0 : index
    %93 = vector.load %arg4[%c0_67, %c0_68] : memref<1x128xf32, #tpu.memory_space<vmem>>, vector<1x128xf32>
    %94 = arith.addf %92, %93 : vector<1x128xf32>
    %c0_69 = arith.constant 0 : index
    %c0_70 = arith.constant 0 : index
    %95 = vector.load %arg5[%c0_69, %c0_70] : memref<128x128xf32, #tpu.memory_space<vmem>>, vector<128x128xf32>
    %cst_71 = arith.constant dense<0.000000e+00> : vector<8x128xf32>
    %96 = tpu.matmul %89, %95, %cst_71 {dimension_numbers = #tpu.dot_dimension_numbers<[1], [0], [0], [1], [0, 0, 1, 1], [], []>} : vector<8x128xf32>, vector<128x128xf32>, vector<8x128xf32> -> vector<8x128xf32>
    %c0_72 = arith.constant 0 : index
    %c0_73 = arith.constant 0 : index
    %97 = vector.load %arg6[%c0_72, %c0_73] : memref<1x128xf32, #tpu.memory_space<vmem>>, vector<1x128xf32>
    %98 = vector.broadcast %97 : vector<1x128xf32> to vector<8x128xf32>
    %99 = arith.addf %96, %98 : vector<8x128xf32>
    %c0_74 = arith.constant 0 : index
    %c0_75 = arith.constant 0 : index
    %100 = vector.load %arg7[%c0_74, %c0_75] : memref<128x128xf32, #tpu.memory_space<vmem>>, vector<128x128xf32>
    %cst_76 = arith.constant dense<0.000000e+00> : vector<8x128xf32>
    %101 = tpu.matmul %89, %100, %cst_76 {dimension_numbers = #tpu.dot_dimension_numbers<[1], [0], [0], [1], [0, 0, 1, 1], [], []>} : vector<8x128xf32>, vector<128x128xf32>, vector<8x128xf32> -> vector<8x128xf32>
    %c0_77 = arith.constant 0 : index
    %c0_78 = arith.constant 0 : index
    %102 = vector.load %arg8[%c0_77, %c0_78] : memref<1x128xf32, #tpu.memory_space<vmem>>, vector<1x128xf32>
    %103 = vector.broadcast %102 : vector<1x128xf32> to vector<8x128xf32>
    %104 = arith.addf %101, %103 : vector<8x128xf32>
    %cst_79 = arith.constant dense<0.000000e+00> : vector<1x8xf32>
    %105 = tpu.matmul %94, %99, %cst_79 {dimension_numbers = #tpu.dot_dimension_numbers<[1], [1], [0], [0], [0, 0, 1, 0], [], []>} : vector<1x128xf32>, vector<8x128xf32>, vector<1x8xf32> -> vector<1x8xf32>
    %cst_80 = arith.constant dense<0xFF800000> : vector<1xf32>
    %106 = vector.multi_reduction <maximumf>, %105, %cst_80 [1] : vector<1x8xf32> to vector<1xf32>
    %107 = vector.shape_cast %106 : vector<1xf32> to vector<1x1xf32>
    %108 = vector.broadcast %107 : vector<1x1xf32> to vector<1x8xf32>
    %109 = arith.subf %105, %108 : vector<1x8xf32>
    %110 = math.exp %109 : vector<1x8xf32>
    %cst_81 = arith.constant dense<0.000000e+00> : vector<1xf32>
    %111 = vector.multi_reduction <add>, %110, %cst_81 [1] : vector<1x8xf32> to vector<1xf32>
    %112 = vector.shape_cast %111 : vector<1xf32> to vector<1x1xf32>
    %113 = vector.broadcast %112 : vector<1x1xf32> to vector<1x8xf32>
    %114 = arith.divf %110, %113 : vector<1x8xf32>
    %cst_82 = arith.constant dense<0.000000e+00> : vector<1x128xf32>
    %115 = tpu.matmul %114, %104, %cst_82 {dimension_numbers = #tpu.dot_dimension_numbers<[1], [0], [0], [1], [0, 0, 1, 1], [], []>} : vector<1x8xf32>, vector<8x128xf32>, vector<1x128xf32> -> vector<1x128xf32>
    %116 = arith.addf %115, %90 : vector<1x128xf32>
    %c0_83 = arith.constant 0 : index
    %c0_84 = arith.constant 0 : index
    %c0_85 = arith.constant 0 : index
    %117 = vector.load %arg9[%c0_83, %c0_84, %c0_85] : memref<1x1x128xf32, #tpu.memory_space<vmem>>, vector<1x1x128xf32>
    %118 = vector.shape_cast %117 : vector<1x1x128xf32> to vector<1x128xf32>
    %119 = vector.shape_cast %116 : vector<1x128xf32> to vector<1x1x128xf32>
    tpu.vector_store %arg9[%c0_83, %c0_84, %c0_85], %119 {strides = array<i32>} : memref<1x1x128xf32, #tpu.memory_space<vmem>>, vector<1x1x128xf32>,
    return
  }
  func.func @transform_1(%arg0: i32, %arg1: memref<16xi32, #tpu.memory_space<smem>>) -> (i32, i32) {
    %c0_i32 = arith.constant 0 : i32
    %c0_i32_0 = arith.constant 0 : i32
    %c0_i32_1 = arith.constant 0 : i32
    return %c0_i32, %c0_i32_0 : i32, i32
  }
  func.func @transform_2(%arg0: i32, %arg1: memref<16xi32, #tpu.memory_space<smem>>) -> (i32, i32) {
    %c0_i32 = arith.constant 0 : i32
    %c0_i32_0 = arith.constant 0 : i32
    %c0_i32_1 = arith.constant 0 : i32
    return %c0_i32, %c0_i32_0 : i32, i32
  }
  func.func @transform_3(%arg0: i32, %arg1: memref<16xi32, #tpu.memory_space<smem>>) -> (i32, i32) {
    %c0_i32 = arith.constant 0 : i32
    %c0_i32_0 = arith.constant 0 : i32
    %c0_i32_1 = arith.constant 0 : i32
    return %c0_i32, %c0_i32_0 : i32, i32
  }
  func.func @transform_4(%arg0: i32, %arg1: memref<16xi32, #tpu.memory_space<smem>>) -> (i32, i32) {
    %c0_i32 = arith.constant 0 : i32
    %c0_i32_0 = arith.constant 0 : i32
    %c0_i32_1 = arith.constant 0 : i32
    return %c0_i32, %c0_i32_0 : i32, i32
  }
  func.func @transform_5(%arg0: i32, %arg1: memref<16xi32, #tpu.memory_space<smem>>) -> (i32, i32) {
    %c0_i32 = arith.constant 0 : i32
    %c0_i32_0 = arith.constant 0 : i32
    %c0_i32_1 = arith.constant 0 : i32
    return %c0_i32, %c0_i32_0 : i32, i32
  }
  func.func @transform_6(%arg0: i32, %arg1: memref<16xi32, #tpu.memory_space<smem>>) -> (i32, i32) {
    %c0_i32 = arith.constant 0 : i32
    %c0_i32_0 = arith.constant 0 : i32
    %c0_i32_1 = arith.constant 0 : i32
    return %c0_i32, %c0_i32_0 : i32, i32
  }
  func.func @transform_7(%arg0: i32, %arg1: memref<16xi32, #tpu.memory_space<smem>>) -> (i32, i32, i32) {
    %c0_i32 = arith.constant 0 : i32
    %c0_i32_0 = arith.constant 0 : i32
    %c0_i32_1 = arith.constant 0 : i32
    return %arg0, %c0_i32, %c0_i32_0 : i32, i32, i32
  }
}

</mosaic_0001>

<bundles_post_ra>
// kernel: tpu_custom_call.1
= control target key start
LH: loop header
LB: loop body
LE: loop exit
PB: predicated region body
PF: predicated region fallthrough
CT: control target
= control target key end

     0   :  { %s2231_s0 = inlined_call_operand.hbm [shape: s32[16], index: 0, kind: input, shape index: {}]   ;;  %s2232_s1 = inlined_call_operand.hbm [shape: f32[64,128], index: 1, kind: input, shape index: {}]   ;;  %s2233_s2 = inlined_call_operand.hbm [shape: f32[128,128], index: 2, kind: input, shape index: {}]   ;;  %s2234_s3 = inlined_call_operand.vmem [shape: f32[1,128], index: 3, kind: input, shape index: {}]   ;;  %s2235_s4 = inlined_call_operand.hbm [shape: f32[128,128], index: 4, kind: input, shape index: {}]   ;;  %s2236_s5 = inlined_call_operand.vmem [shape: f32[1,128], index: 5, kind: input, shape index: {}]   ;;  %s2237_s6 = inlined_call_operand.hbm [shape: f32[128,128], index: 6, kind: input, shape index: {}]   ;;  %s2238_s7 = inlined_call_operand.vmem [shape: f32[1,128], index: 7, kind: input, shape index: {}]   ;;  %s2239_s8 = inlined_call_operand.hbm [shape: f32[2,1,128], index: 8, kind: output, shape index: {}]  }
   0x1   :  { %2247 = sst [smem:[#allocation47_spill]] %s2233_s2  ;;  %s1384_s29 = scalar_lea.hbm %s2231_s0, 16 }
   0x2   :  { %2248 = sst [smem:[#allocation48_spill]] %s2235_s4  ;;  %p1385_p0 = scmp.ne.s32.totalorder %s2231_s0, %s1384_s29 }
   0x3   :  { %2249 = sst [smem:[#allocation49_spill]] %s2237_s6  ;;  %p1388_p1 = scmp.lt.u32.totalorder %s1384_s29, %s2231_s0 }
   0x5   :  { %p1390_p2 = pnand %p1388_p1, %p1385_p0 }
   0x7   :  { %1393 = shalt.err (!%p1390_p2)  }
   0x8   :  { %s1760_s12 = smov [#allocation5]  }
   0x9   :  { %14 = dma.hbm_to_smem %s2231_s0, 16, %s1760_s12, [#allocation4] }
   0xa   :  { %1714 = dma.done.wait [#allocation4], 16 }
   0xb   :  { %1715 = vsyncadd [#allocation4], 4294967280 }
   0xc   :  { %16 = sfence }
   0xd   :  { %17 = vsyncpa [#allocation7], 0 }
   0xe   :  { %18 = vsyncpa [#allocation10], 0 }
   0xf   :  { %19 = vsyncpa [#allocation8], 0 }
  0x10   :  { %21 = vsyncpa [#allocation8 + $0x1], 0  ;;  %s1835_s15 = smov 0   ;;  %s1837_s16 = smov 0  }
  0x11   :  { %s1839_s17 = smov 0   ;;  %s1841_s18 = smov 0  }
  0x12 LB: > { %2250 = sst [smem:[#allocation43_spill]] %s1754_s17  ;;  %s1856_s0 = sadd.s32 4294967295, %s1758_s18   ;;  %s1758_s18 = sphi %s1841_s18, %s2272_s18   ;;  %s1754_s17 = sphi %s1839_s17, %s2274_s17   ;;  %s1750_s16 = sphi %s1837_s16, %s2276_s16   ;;  %s1746_s15 = sphi %s1835_s15, %s2275_s15  }
  0x13   : > { %s1022_s19 = sadd.s32 4294967294, %s1758_s18   ;;  %s1860_s20 = sadd.s32 1, %s1758_s18  }
  0x14   : > { %2251 = sst [smem:[#allocation44_spill]] %s1860_s20  ;;  %s160_s21 = sadd.s32 1, %s1754_s17 }
  0x15   : > { %s157_s22 = ssub.s32 %s1758_s18, %s1860_s20  ;;  %p170_p3 = scmp.ne.s32.totalorder %s1754_s17, %s1750_s16 }
  0x16   : > { %p158_p4 = scmp.eq.s32.totalorder %s157_s22, 0  ;;  %p171_p5 = scmp.eq.s32.totalorder %s1856_s0, 1 }
  0x17   : > { %p176_p6 = scmp.ne.s32.totalorder %s1750_s16, %s1746_s15  ;;  %p177_p7 = scmp.eq.s32.totalorder %s1022_s19, 1 }
  0x18   : > { %s1871_s23 = scalar_select %p158_p4, %s1754_s17, %s160_s21  }
  0x19   : > { %p1873_p8 = por %p171_p5, %p170_p3  ;;  %p1877_p9 = por %p177_p7, %p176_p6 }
  0x1a   : > { %2252 = sst [smem:[#allocation45_spill]] %s1871_s23  ;;  %p1023_p10 = scmp.ge.s32.totalorder %s1758_s18, 1 }
  0x1b   : > { %s2253_s24 = scalar_select %p1873_p8, 1, 0 }
  0x1c   : > { %s2254_s25 = scalar_select %p1877_p9, 1, 0 }
  0x1d   : > { %p184_p11 = scmp.lt.s32.totalorder %s1758_s18, 3  ;;  %p2240_p12 = scmp.eq.s32.totalorder %s1856_s0, 0 }
  0x1e   : > { %2255 = sst [smem:[#allocation46_spill]] %s2254_s25  ;;  %s1761_s27 = smov [#allocation9]  }
  0x1f   : > { %p1884_p13 = pnand %p1023_p10, %p184_p11  ;;  %s212_s28 = sshll.u32 %s1761_s27, 4  ;;  %s1890_s28 = int_to_ptr.vmem [resolvable:$true] %s212_s28 }
  0x20   : > { %s1762_s30 = smov [#allocation6]   ;;  %s1763_s10 = smov [#allocation11]  }
  0x21   : > { %s2256_s26 = scalar_select %p1884_p13, 1, 0 }
  0x22   : > { %p1310_p0 = pneg %p1884_p13  ;;  %s196_s9 = sshll.u32 %s1762_s30, 4  ;;  %s1898_s9 = int_to_ptr.vmem [resolvable:$true] %s196_s9 }
  0x23   : > { %s1900_s11 = sshll.u32 %s1763_s10, 4  ;;  %s2258_s4 = sld [smem:[#allocation48_spill]]  ;;  %s229_s11 = int_to_ptr.vmem [resolvable:$true] %s1900_s11 }
  0x24   : > { %p1894_p1 = pnand %p2240_p12, %p1310_p0 }
  0x26   : > { %p1910_p3 = pneg %p1894_p1 }
  0x29   : > { %s1394_s14 = scalar_lea.hbm %s2258_s4, 2048 }
  0x2a   : > { %p1395_p2 = scmp.ne.s32.totalorder %s2258_s4, %s1394_s14  ;;  %p1401_p6 = scmp.lt.u32.totalorder %s1394_s14, %s2258_s4 }
  0x2c   : > { %p1397_p4 = pnand %p1910_p3, %p1395_p2 }
  0x2e   : > { %p1398_p5 = pneg %p1397_p4 }
  0x30   : > { %p1403_p7 = pnand %p1401_p6, %p1398_p5 }
  0x32   : > { %1406 = shalt.err (!%p1403_p7)
}
  0x33   : > { %s1407_s10 = scalar_lea.vmem %s1890_s28, 2048  ;;  %p1415_p12 = scmp.lt.s32.totalorder %s1890_s28, %s1890_s28 }
  0x34   : > { %p1408_p10 = scmp.ne.s32.totalorder %s1890_s28, %s1407_s10  ;;  %p1416_p9 = scmp.lt.s32.totalorder %s1407_s10, %s1407_s10 }
  0x36   : > { %p1410_p11 = pnand %p1408_p10, %p1910_p3  ;;  %p1417_p2 = por %p1416_p9, %p1415_p12 }
  0x38   : > { %p1411_p0 = pneg %p1410_p11 }
  0x3a   : > { %p1418_p4 = pnand %p1417_p2, %p1411_p0 }
  0x3c   : > { %1421 = shalt.err (!%p1418_p4)
}
  0x3d   : > { %s1764_s12 = smov 128   ;;  %s1765_s13 = smov 8  }
  0x3e   : > { %1316 = dma.hbm_to_vmem [thread:$0]  (!%p1894_p1), %s2258_s4, 2048, %s1890_s28, [#allocation10], %s1764_s12, %s1764_s12, %s1765_s13  }
  0x3f   : > { %s2260_s2 = sld [smem:[#allocation47_spill]] }
  0x45   : > { %s1422_s30 = scalar_lea.hbm %s2260_s2, 2048 }
  0x46   : > { %p1423_p9 = scmp.ne.s32.totalorder %s2260_s2, %s1422_s30  ;;  %p1429_p6 = scmp.lt.u32.totalorder %s1422_s30, %s2260_s2 }
  0x48   : > { %p1425_p12 = pnand %p1423_p9, %p1910_p3 }
  0x4a   : > { %p1426_p5 = pneg %p1425_p12 }
  0x4c   : > { %p1431_p7 = pnand %p1429_p6, %p1426_p5 }
  0x4e   : > { %1434 = shalt.err (!%p1431_p7)
}
  0x4f   : > { %s1435_s28 = scalar_lea.vmem %s1898_s9, 2048  ;;  %p1443_p2 = scmp.lt.s32.totalorder %s1898_s9, %s1898_s9 }
  0x50   : > { %p1436_p10 = scmp.ne.s32.totalorder %s1898_s9, %s1435_s28  ;;  %p1444_p4 = scmp.lt.s32.totalorder %s1435_s28, %s1435_s28 }
  0x52   : > { %p1438_p11 = pnand %p1436_p10, %p1910_p3  ;;  %p1445_p9 = por %p1444_p4, %p1443_p2 }
  0x54   : > { %p1439_p0 = pneg %p1438_p11 }
  0x56   : > { %p1446_p12 = pnand %p1445_p9, %p1439_p0 }
  0x58   : > { %1449 = shalt.err (!%p1446_p12)
}
  0x59   : > { %1313 = dma.hbm_to_vmem [thread:$0]  (!%p1894_p1), %s2260_s2, 2048, %s1898_s9, [#allocation7], %s1764_s12, %s1764_s12, %s1765_s13  }
  0x5a   : > { %s2261_s6 = sld [smem:[#allocation49_spill]] }
  0x60   : > { %s1450_s19 = scalar_lea.hbm %s2261_s6, 2048 }
  0x61   : > { %p1451_p5 = scmp.ne.s32.totalorder %s2261_s6, %s1450_s19  ;;  %p1457_p10 = scmp.lt.u32.totalorder %s1450_s19, %s2261_s6 }
  0x63   : > { %p1453_p6 = pnand %p1451_p5, %p1910_p3 }
  0x65   : > { %p1454_p7 = pneg %p1453_p6 }
  0x67   : > { %p1459_p11 = pnand %p1457_p10, %p1454_p7 }
  0x69   : > { %1462 = shalt.err (!%p1459_p11)
}
  0x6a   : > { %s1463_s28 = scalar_lea.vmem %s229_s11, 2048  ;;  %p1471_p9 = scmp.lt.s32.totalorder %s229_s11, %s229_s11 }
  0x6b   : > { %p1464_p0 = scmp.ne.s32.totalorder %s229_s11, %s1463_s28  ;;  %p1472_p12 = scmp.lt.s32.totalorder %s1463_s28, %s1463_s28 }
  0x6d   : > { %p1466_p2 = pnand %p1464_p0, %p1910_p3  ;;  %p1473_p8 = por %p1472_p12, %p1471_p9 }
  0x6f   : > { %p1467_p4 = pneg %p1466_p2 }
  0x71   : > { %p1474_p13 = pnand %p1473_p8, %p1467_p4 }
  0x73   : > { %1477 = shalt.err (!%p1474_p13)
}
  0x74   : > { %1319 = dma.hbm_to_vmem [thread:$0]  (!%p1894_p1), %s2261_s6, 2048, %s229_s11, [#allocation10], %s1764_s12, %s1764_s12, %s1765_s13  }
  0x75   : > { %p2262_p5 = scmp.ne.s32.totalorder %s2256_s26, 0 }
  0x76   : > { %p2263_p3 = scmp.eq.s32.totalorder (!%p2262_p5), %s1856_s0, 0 }
  0x77   : > { %247 = sbr.rel (%p2262_p5) target bundleno = 1336 (0x538), region = 44 }
  0x7e   : > { %1717 = dma.done.wait (%p2263_p3), [#allocation7], 2048   ;;  %p2264_p6 = pmov %p2263_p3 }
  0x7f   : > { %p2265_p8 = pmov %p2263_p3 }
  0x80   : > { %1719 = vsyncadd (%p2264_p6), [#allocation7], 4294965248 }
  0x81   : > { %1721 = dma.done.wait (%p2265_p8), [#allocation10], 4096   ;;  %p2266_p13 = pmov %p2263_p3 }
  0x82   : > { %s1994_s22 = sshll.u32 %s1856_s0, 3  ;;  %s1766_s12 = smov [#allocation2]  }
  0x83   : > { %1723 = vsyncadd (%p2266_p13), [#allocation10], 4294963200  ;;  %s280_s26 = sld [smem:[#allocation5 + %s1994_s22]]  ;;  %s294_s11 = sadd.s32 1, %s1994_s22 }
  0x84   : > { %s290_s13 = sshll.u32 %s1766_s12, 4  ;;  %s1998_s20 = sld [smem:[#allocation5 + %s294_s11]]  ;;  %s2000_s13 = int_to_ptr.vmem [resolvable:$true] %s290_s13 }
  0x85   : > { %s1767_s23 = smov [#allocation2 + $0x1]   ;;  %s311_s19 = sadd.s32 2, %s1994_s22 }
  0x86   : > { %s307_s14 = sshll.u32 %s1767_s23, 4  ;;  %s2005_s21 = sld [smem:[#allocation5 + %s311_s19]]  ;;  %s2003_s14 = int_to_ptr.vmem [resolvable:$true] %s307_s14 }
  0x87   : > { %s1768_s9 = smov [#allocation2 + $0x2]   ;;  %s2013_s2 = scalar_lea.hbm %s2232_s1, 1024 }
  0x88   : > { %s324_s17 = sshll.u32 %s1768_s9, 4  ;;  %s2029_s17 = int_to_ptr.vmem [resolvable:$true] %s324_s17 }
  0x89   : > { %s1032_s27 = sshll.u32 %s280_s26, 4 }
  0x8a   : > { %s282_s28 = scalar_lea.hbm %s2232_s1, %s1032_s27 }
  0x8b   : > { %s1478_s29 = scalar_lea.hbm %s282_s28, 16  ;;  %p1481_p7 = scmp.lt.u32.totalorder %s282_s28, %s2232_s1 }
  0x8c   : > { %p1479_p1 = scmp.ne.s32.totalorder %s282_s28, %s1478_s29  ;;  %p1482_p10 = scmp.lt.u32.totalorder %s2013_s2, %s1478_s29 }
  0x8d   : > { %p1484_p0 = scmp.lt.u32.totalorder %s1478_s29, %s282_s28 }
  0x8e   : > { %p1483_p11 = por %p1482_p10, %p1481_p7 }
  0x90   : > { %p1485_p2 = por %p1484_p0, %p1483_p11 }
  0x92   : > { %p1486_p4 = pnand %p1485_p2, %p1479_p1 }
  0x94   : > { %1489 = shalt.err (!%p1486_p4)  }
  0x95   : > { %s1490_s26 = scalar_lea.vmem %s2000_s13, 16  ;;  %s2022_s19 = scalar_lea.vmem %s2000_s13, 128 }
  0x96   : > { %p1491_p9 = scmp.ne.s32.totalorder %s2000_s13, %s1490_s26  ;;  %p1495_p12 = scmp.lt.s32.totalorder %s2000_s13, %s2000_s13 }
  0x97   : > { %p1496_p5 = scmp.lt.s32.totalorder %s2022_s19, %s1490_s26 }
  0x99   : > { %p1497_p3 = por %p1496_p5, %p1495_p12 }
  0x9b   : > { %p1498_p6 = pnand %p1497_p3, %p1491_p9 }
  0x9d   : > { %1501 = shalt.err (!%p1498_p6)  }
  0x9e   : > { %293 = dma.hbm_to_vmem [thread:$0]  %s282_s28, 16, %s2000_s13, [#allocation3] }
  0x9f   : > { %s1033_s4 = sshll.u32 %s1998_s20, 4  ;;  %s328_s10 = sadd.s32 3, %s1994_s22 }
  0xa0   : > { %s297_s30 = scalar_lea.hbm %s2232_s1, %s1033_s4 }
  0xa1   : > { %s1502_s9 = scalar_lea.hbm %s297_s30, 16  ;;  %p1505_p13 = scmp.lt.u32.totalorder %s297_s30, %s2232_s1 }
  0xa2   : > { %p1503_p8 = scmp.ne.s32.totalorder %s297_s30, %s1502_s9  ;;  %p1506_p1 = scmp.lt.u32.totalorder %s2013_s2, %s1502_s9 }
  0xa3   : > { %p1508_p10 = scmp.lt.u32.totalorder %s1502_s9, %s297_s30 }
  0xa4   : > { %p1507_p7 = por %p1506_p1, %p1505_p13 }
  0xa6   : > { %p1509_p11 = por %p1508_p10, %p1507_p7 }
  0xa8   : > { %p1510_p0 = pnand %p1509_p11, %p1503_p8 }
  0xaa   : > { %1513 = shalt.err (!%p1510_p0)  }
  0xab   : > { %s1514_s20 = scalar_lea.vmem %s2003_s14, 16  ;;  %p1519_p4 = scmp.lt.s32.totalorder %s2003_s14, %s2000_s13 }
  0xac   : > { %p1515_p2 = scmp.ne.s32.totalorder %s2003_s14, %s1514_s20  ;;  %p1520_p9 = scmp.lt.s32.totalorder %s2022_s19, %s1514_s20 }
  0xae   : > { %p1521_p12 = por %p1520_p9, %p1519_p4 }
  0xb0   : > { %p1522_p5 = pnand %p1521_p12, %p1515_p2 }
  0xb2   : > { %1525 = shalt.err (!%p1522_p5)  }
  0xb3   : > { %310 = dma.hbm_to_vmem [thread:$0]  %s297_s30, 16, %s2003_s14, [#allocation3 + $0x1] }
  0xb4   : > { %s1034_s28 = sshll.u32 %s2005_s21, 4  ;;  %s2046_s23 = sld [smem:[#allocation5 + %s328_s10]] }
  0xb5   : > { %s314_s29 = scalar_lea.hbm %s2232_s1, %s1034_s28 }
  0xb6   : > { %s1526_s27 = scalar_lea.hbm %s314_s29, 16  ;;  %p1529_p6 = scmp.lt.u32.totalorder %s314_s29, %s2232_s1 }
  0xb7   : > { %p1527_p3 = scmp.ne.s32.totalorder %s314_s29, %s1526_s27  ;;  %p1530_p8 = scmp.lt.u32.totalorder %s2013_s2, %s1526_s27 }
  0xb8   : > { %p1532_p1 = scmp.lt.u32.totalorder %s1526_s27, %s314_s29 }
  0xb9   : > { %p1531_p13 = por %p1530_p8, %p1529_p6 }
  0xbb   : > { %p1533_p7 = por %p1532_p1, %p1531_p13 }
  0xbd   : > { %p1534_p10 = pnand %p1533_p7, %p1527_p3 }
  0xbf   : > { %1537 = shalt.err (!%p1534_p10)  }
  0xc0   : > { %s1538_s14 = scalar_lea.vmem %s2029_s17, 16  ;;  %p1543_p0 = scmp.lt.s32.totalorder %s2029_s17, %s2000_s13 }
  0xc1   : > { %p1539_p11 = scmp.ne.s32.totalorder %s2029_s17, %s1538_s14  ;;  %p1544_p2 = scmp.lt.s32.totalorder %s2022_s19, %s1538_s14 }
  0xc3   : > { %p1545_p4 = por %p1544_p2, %p1543_p0 }
  0xc5   : > { %p1546_p9 = pnand %p1545_p4, %p1539_p11 }
  0xc7   : > { %1549 = shalt.err (!%p1546_p9)  }
  0xc8   : > { %327 = dma.hbm_to_vmem [thread:$0]  %s314_s29, 16, %s2029_s17, [#allocation3 + $0x2] }
  0xc9   : > { %s1769_s21 = smov [#allocation2 + $0x3]   ;;  %s345_s10 = sadd.s32 4, %s1994_s22 }
  0xca   : > { %s341_s30 = sshll.u32 %s1769_s21, 4  ;;  %s346_s12 = sld [smem:[#allocation5 + %s345_s10]]  ;;  %s342_s30 = int_to_ptr.vmem [resolvable:$true] %s341_s30 }
  0xcb   : > { %s362_s20 = sadd.s32 5, %s1994_s22  ;;  %s1035_s28 = sshll.u32 %s2046_s23, 4 }
  0xcc   : > { %s1770_s26 = smov [#allocation2 + $0x4]   ;;  %s331_s11 = scalar_lea.hbm %s2232_s1, %s1035_s28 }
  0xcd   : > { %s358_s4 = sshll.u32 %s1770_s26, 4  ;;  %s1550_s14 = scalar_lea.hbm %s331_s11, 16  ;;  %s2067_s4 = int_to_ptr.vmem [resolvable:$true] %s358_s4 }
  0xce   : > { %p1551_p12 = scmp.ne.s32.totalorder %s331_s11, %s1550_s14  ;;  %p1553_p5 = scmp.lt.u32.totalorder %s331_s11, %s2232_s1 }
  0xcf   : > { %p1554_p3 = scmp.lt.u32.totalorder %s2013_s2, %s1550_s14  ;;  %p1556_p8 = scmp.lt.u32.totalorder %s1550_s14, %s331_s11 }
  0xd1   : > { %p1555_p6 = por %p1554_p3, %p1553_p5 }
  0xd3   : > { %p1557_p13 = por %p1556_p8, %p1555_p6 }
  0xd5   : > { %p1558_p1 = pnand %p1557_p13, %p1551_p12 }
  0xd7   : > { %1561 = shalt.err (!%p1558_p1)  }
  0xd8   : > { %s1562_s17 = scalar_lea.vmem %s342_s30, 16  ;;  %p1567_p10 = scmp.lt.s32.totalorder %s342_s30, %s2000_s13 }
  0xd9   : > { %p1563_p7 = scmp.ne.s32.totalorder %s342_s30, %s1562_s17  ;;  %p1568_p11 = scmp.lt.s32.totalorder %s2022_s19, %s1562_s17 }
  0xdb   : > { %p1569_p0 = por %p1568_p11, %p1567_p10 }
  0xdd   : > { %p1570_p2 = pnand %p1569_p0, %p1563_p7 }
  0xdf   : > { %1573 = shalt.err (!%p1570_p2)  }
  0xe0   : > { %344 = dma.hbm_to_vmem [thread:$0]  %s331_s11, 16, %s342_s30, [#allocation3 + $0x3] }
  0xe1   : > { %s2075_s23 = sld [smem:[#allocation5 + %s362_s20]]  ;;  %s1036_s6 = sshll.u32 %s346_s12, 4 }
  0xe2   : > { %s348_s21 = scalar_lea.hbm %s2232_s1, %s1036_s6  ;;  %s1771_s10 = smov [#allocation2 + $0x5]  }
  0xe3   : > { %s375_s28 = sshll.u32 %s1771_s10, 4  ;;  %s1574_s26 = scalar_lea.hbm %s348_s21, 16  ;;  %s376_s28 = int_to_ptr.vmem [resolvable:$true] %s375_s28 }
  0xe4   : > { %p1575_p4 = scmp.ne.s32.totalorder %s348_s21, %s1574_s26  ;;  %p1577_p9 = scmp.lt.u32.totalorder %s348_s21, %s2232_s1 }
  0xe5   : > { %p1578_p12 = scmp.lt.u32.totalorder %s2013_s2, %s1574_s26  ;;  %p1580_p3 = scmp.lt.u32.totalorder %s1574_s26, %s348_s21 }
  0xe7   : > { %p1579_p5 = por %p1578_p12, %p1577_p9 }
  0xe9   : > { %p1581_p6 = por %p1580_p3, %p1579_p5 }
  0xeb   : > { %p1582_p8 = pnand %p1581_p6, %p1575_p4 }
  0xed   : > { %1585 = shalt.err (!%p1582_p8)  }
  0xee   : > { %s1586_s30 = scalar_lea.vmem %s2067_s4, 16  ;;  %p1591_p1 = scmp.lt.s32.totalorder %s2067_s4, %s2000_s13 }
  0xef   : > { %p1587_p13 = scmp.ne.s32.totalorder %s2067_s4, %s1586_s30  ;;  %p1592_p7 = scmp.lt.s32.totalorder %s2022_s19, %s1586_s30 }
  0xf1   : > { %p1593_p10 = por %p1592_p7, %p1591_p1 }
  0xf3   : > { %p1594_p11 = pnand %p1593_p10, %p1587_p13 }
  0xf5   : > { %1597 = shalt.err (!%p1594_p11)  }
  0xf6   : > { %361 = dma.hbm_to_vmem [thread:$0]  %s348_s21, 16, %s2067_s4, [#allocation3 + $0x4] }
  0xf7   : > { %s379_s12 = sadd.s32 6, %s1994_s22  ;;  %s1037_s11 = sshll.u32 %s2075_s23, 4 }
  0xf8   : > { %s2091_s20 = sld [smem:[#allocation5 + %s379_s12]]  ;;  %s1772_s14 = smov [#allocation2 + $0x6]  }
  0xf9   : > { %s392_s17 = sshll.u32 %s1772_s14, 4  ;;  %s365_s29 = scalar_lea.hbm %s2232_s1, %s1037_s11  ;;  %s393_s17 = int_to_ptr.vmem [resolvable:$true] %s392_s17 }
  0xfa   : > { %s396_s10 = sadd.s32 7, %s1994_s22  ;;  %s1598_s26 = scalar_lea.hbm %s365_s29, 16 }
  0xfb   : > { %p1599_p0 = scmp.ne.s32.totalorder %s365_s29, %s1598_s26  ;;  %p1601_p2 = scmp.lt.u32.totalorder %s365_s29, %s2232_s1 }
  0xfc   : > { %p1602_p4 = scmp.lt.u32.totalorder %s2013_s2, %s1598_s26  ;;  %p1604_p12 = scmp.lt.u32.totalorder %s1598_s26, %s365_s29 }
  0xfe   : > { %p1603_p9 = por %p1602_p4, %p1601_p2 }
 0x100   : > { %p1605_p5 = por %p1604_p12, %p1603_p9 }
 0x102   : > { %p1606_p3 = pnand %p1605_p5, %p1599_p0 }
 0x104   : > { %1609 = shalt.err (!%p1606_p3)  }
 0x105   : > { %s1610_s4 = scalar_lea.vmem %s376_s28, 16  ;;  %p1615_p8 = scmp.lt.s32.totalorder %s376_s28, %s2000_s13 }
 0x106   : > { %p1611_p6 = scmp.ne.s32.totalorder %s376_s28, %s1610_s4  ;;  %p1616_p13 = scmp.lt.s32.totalorder %s2022_s19, %s1610_s4 }
 0x108   : > { %p1617_p1 = por %p1616_p13, %p1615_p8 }
 0x10a   : > { %p1618_p7 = pnand %p1617_p1, %p1611_p6 }
 0x10c   : > { %1621 = shalt.err (!%p1618_p7)  }
 0x10d   : > { %378 = dma.hbm_to_vmem [thread:$0]  %s365_s29, 16, %s376_s28, [#allocation3 + $0x5] }
 0x10e   : > { %s397_s22 = sld [smem:[#allocation5 + %s396_s10]]  ;;  %s1038_s23 = sshll.u32 %s2091_s20, 4 }
 0x10f   : > { %s1773_s21 = smov [#allocation2 + $0x7]   ;;  %s382_s14 = scalar_lea.hbm %s2232_s1, %s1038_s23 }
 0x110   : > { %s409_s30 = sshll.u32 %s1773_s21, 4  ;;  %s1622_s6 = scalar_lea.hbm %s382_s14, 16  ;;  %s410_s30 = int_to_ptr.vmem [resolvable:$true] %s409_s30 }
 0x111   : > { %p1623_p10 = scmp.ne.s32.totalorder %s382_s14, %s1622_s6  ;;  %p1625_p11 = scmp.lt.u32.totalorder %s382_s14, %s2232_s1 }
 0x112   : > { %p1626_p0 = scmp.lt.u32.totalorder %s2013_s2, %s1622_s6  ;;  %p1628_p4 = scmp.lt.u32.totalorder %s1622_s6, %s382_s14 }
 0x114   : > { %p1627_p2 = por %p1626_p0, %p1625_p11 }
 0x116   : > { %p1629_p9 = por %p1628_p4, %p1627_p2 }
 0x118   : > { %p1630_p12 = pnand %p1629_p9, %p1623_p10 }
 0x11a   : > { %1633 = shalt.err (!%p1630_p12)  }
 0x11b   : > { %s1634_s28 = scalar_lea.vmem %s393_s17, 16  ;;  %p1639_p3 = scmp.lt.s32.totalorder %s393_s17, %s2000_s13 }
 0x11c   : > { %p1635_p5 = scmp.ne.s32.totalorder %s393_s17, %s1634_s28  ;;  %p1640_p6 = scmp.lt.s32.totalorder %s2022_s19, %s1634_s28 }
 0x11e   : > { %p1641_p8 = por %p1640_p6, %p1639_p3 }
 0x120   : > { %p1642_p13 = pnand %p1641_p8, %p1635_p5 }
 0x122   : > { %1645 = shalt.err (!%p1642_p13)  }
 0x123   : > { %395 = dma.hbm_to_vmem [thread:$0]  %s382_s14, 16, %s393_s17, [#allocation3 + $0x6] }
 0x124   : > { %s1039_s20 = sshll.u32 %s397_s22, 4 }
 0x125   : > { %s399_s27 = scalar_lea.hbm %s2232_s1, %s1039_s20 }
 0x126   : > { %s1646_s9 = scalar_lea.hbm %s399_s27, 16  ;;  %p1649_p7 = scmp.lt.u32.totalorder %s399_s27, %s2232_s1 }
 0x127   : > { %p1647_p1 = scmp.ne.s32.totalorder %s399_s27, %s1646_s9  ;;  %p1650_p10 = scmp.lt.u32.totalorder %s2013_s2, %s1646_s9 }
 0x128   : > { %p1652_p0 = scmp.lt.u32.totalorder %s1646_s9, %s399_s27 }
 0x129   : > { %p1651_p11 = por %p1650_p10, %p1649_p7 }
 0x12b   : > { %p1653_p2 = por %p1652_p0, %p1651_p11 }
 0x12d   : > { %p1654_p4 = pnand %p1653_p2, %p1647_p1 }
 0x12f   : > { %1657 = shalt.err (!%p1654_p4)  }
 0x130   : > { %s1658_s17 = scalar_lea.vmem %s410_s30, 16  ;;  %p1663_p12 = scmp.lt.s32.totalorder %s410_s30, %s2000_s13 }
 0x131   : > { %p1659_p9 = scmp.ne.s32.totalorder %s410_s30, %s1658_s17  ;;  %p1664_p5 = scmp.lt.s32.totalorder %s2022_s19, %s1658_s17 }
 0x133   : > { %p1665_p3 = por %p1664_p5, %p1663_p12 }
 0x135   : > { %p1666_p6 = pnand %p1665_p3, %p1659_p9 }
 0x137   : > { %1669 = shalt.err (!%p1666_p6)  }
 0x138   : > { %412 = dma.hbm_to_vmem [thread:$0]  %s399_s27, 16, %s410_s30, [#allocation3 + $0x7] }
 0x139   : > { %s2267_s22 = sand.u32 1, %s1750_s16  }
 0x13a   : > { %s2125_s21 = scalar_lea.vmem [#allocation12], %s2267_s22 }
 0x13b   : > { %1724 = dma.done.wait [#allocation3], 16 }
 0x13c   : > { %1725 = vsyncadd [#allocation3], 4294967280 }
 0x13d   : > { %1726 = dma.done.wait [#allocation3 + $0x1], 16 }
 0x13e   : > { %1727 = vsyncadd [#allocation3 + $0x1], 4294967280 }
 0x13f   : > { %1728 = dma.done.wait [#allocation3 + $0x2], 16 }
 0x140   : > { %1729 = vsyncadd [#allocation3 + $0x2], 4294967280 }
 0x141   : > { %1730 = dma.done.wait [#allocation3 + $0x3], 16 }
 0x142   : > { %1731 = vsyncadd [#allocation3 + $0x3], 4294967280 }
 0x143   : > { %1732 = dma.done.wait [#allocation3 + $0x4], 16 }
 0x144   : > { %1733 = vsyncadd [#allocation3 + $0x4], 4294967280 }
 0x145   : > { %1734 = dma.done.wait [#allocation3 + $0x5], 16 }
 0x146   : > { %1735 = vsyncadd [#allocation3 + $0x5], 4294967280 }
 0x147   : > { %1736 = dma.done.wait [#allocation3 + $0x6], 16 }
 0x148   : > { %1737 = vsyncadd [#allocation3 + $0x6], 4294967280 }
 0x149   : > { %1738 = dma.done.wait [#allocation3 + $0x7], 16 }
 0x14a   : > { %1739 = vsyncadd [#allocation3 + $0x7], 4294967280  ;;  %v1774_v0 = vmov 0.0|0.0   ;;  %vm1775_vm0 = vmmov 0   ;;  %v1776_v1 = vmov 0.0   ;;  %v521_v2 = vld [vmem:[#allocation9] sm:$0xff]  ;;  %s2268_s20 = smov %s2267_s22 }
 0x14b   : > { %1248 = vmatprep.subr.bf16.mxu1 %v1774_v0  ;;  %1224 = vmatprep.subr.bf16.mxu0 %v1774_v0  ;;  %v522_v3 = vld [vmem:[#allocation9 + $0x8] sm:$0xff]  ;;  %v431_v4 = vld [vmem:[#allocation6] sm:$0xff]  ;;  %v523_v7 = vld [vmem:[#allocation9 + $0x10] sm:$0xff]  ;;  %vm777_vm1 = vcmask 57344   ;;  %vm789_vm2 = vcmask 64512   ;;  %s1043_s14 = sshll.u32 %s1856_s0, 4 }
 0x14c   : > { %1176 = vmatprep.mubr.msk.f32.mxu1 %vm1775_vm0, %v1776_v1  ;;  %1141 = vmatprep.mubr.msk.f32.mxu0 %vm1775_vm0, %v1776_v1  ;;  %v1249_v5 = vpack.c.bf16 %v522_v3, %v521_v2  ;;  %v432_v6 = vld [vmem:[#allocation6 + $0x8] sm:$0xff]  ;;  %v524_v8 = vld [vmem:[#allocation9 + $0x18] sm:$0xff]  ;;  %v433_v10 = vld [vmem:[#allocation6 + $0x10] sm:$0xff]  ;;  %s877_s6 = sshll.u32 %s2125_s21, 4  ;;  %s2186_s28 = scalar_lea.hbm %s2239_s8, %s1043_s14  ;;  %s2188_s6 = int_to_ptr.vmem [resolvable:$true] %s877_s6 }
 0x14d   : > { %v1225_v9 = vpack.c.bf16 %v432_v6, %v431_v4  ;;  %v434_v11 = vld [vmem:[#allocation6 + $0x18] sm:$0xff]  ;;  %v1252_v12 = vpack.c.bf16 %v524_v8, %v523_v7  ;;  %v525_v14 = vld [vmem:[#allocation9 + $0x20] sm:$0xff]  ;;  %v526_v15 = vld [vmem:[#allocation9 + $0x28] sm:$0xff]  ;;  %s865_s29 = scalar_lea.sflag [#allocation8], %s2268_s20  ;;  %s1670_s0 = scalar_lea.vmem %s2188_s6, 16 }
 0x14e   : > { %1250 = vmatpush3.bf16.msra.mxu1 %v1249_v5  ;;  %v1228_v13 = vpack.c.bf16 %v434_v11, %v433_v10  ;;  %v435_v16 = vld [vmem:[#allocation6 + $0x20] sm:$0xff]  ;;  %v436_v17 = vld [vmem:[#allocation6 + $0x28] sm:$0xff]  ;;  %v1255_v18 = vpack.c.bf16 %v526_v15, %v525_v14  ;;  %v527_v20 = vld [vmem:[#allocation9 + $0x30] sm:$0xff]  ;;  %p1671_p8 = scmp.ne.s32.totalorder %s2188_s6, %s1670_s0  ;;  %p2269_p13 = scmp.ne.s32.totalorder %s2253_s24, 0 }
 0x14f   : > { %1226 = vmatpush3.bf16.msra.mxu0 %v1225_v9  ;;  %1251 = vmatprep.subr.bf16.mxu1 %v1774_v0  ;;  %v1231_v19 = vpack.c.bf16 %v436_v17, %v435_v16  ;;  %v528_v21 = vld [vmem:[#allocation9 + $0x38] sm:$0xff]  ;;  %v437_v22 = vld [vmem:[#allocation6 + $0x30] sm:$0xff]  ;;  %v529_v26 = vld [vmem:[#allocation9 + $0x40] sm:$0xff]  ;;  %s1777_s10 = smov [#allocation12]  }
 0x150   : > { %1227 = vmatprep.subr.bf16.mxu0 %v1774_v0  ;;  %v438_v23 = vld [vmem:[#allocation6 + $0x38] sm:$0xff]  ;;  %v1258_v24 = vpack.c.bf16 %v528_v21, %v527_v20  ;;  %v530_v27 = vld [vmem:[#allocation9 + $0x48] sm:$0xff]  ;;  %v439_v28 = vld [vmem:[#allocation6 + $0x40] sm:$0xff]  ;;  %p1672_p1 = pnand %p1671_p8, %p2269_p13  ;;  %s1674_s27 = sshll.u32 %s1777_s10, 4  ;;  %s1675_s27 = int_to_ptr.vmem [resolvable:$false] %s1674_s27 }
 0x151   : > { %v1234_v25 = vpack.c.bf16 %v438_v23, %v437_v22  ;;  %v440_v29 = vld [vmem:[#allocation6 + $0x48] sm:$0xff]  ;;  %v1261_v30 = vpack.c.bf16 %v530_v27, %v529_v26  ;;  %v531_v32 = vld [vmem:[#allocation9 + $0x50] sm:$0xff]  ;;  %v532_v33 = vld [vmem:[#allocation9 + $0x58] sm:$0xff]  ;;  %s1676_s9 = scalar_lea.vmem %s1675_s27, 32  ;;  %p1677_p10 = scmp.lt.s32.totalorder %s2188_s6, %s1675_s27 }
 0x152   : > { %1253 = vmatpush3.bf16.msra.mxu1 %v1252_v12  ;;  %v1237_v31 = vpack.c.bf16 %v440_v29, %v439_v28  ;;  %v441_v34 = vld [vmem:[#allocation6 + $0x50] sm:$0xff]  ;;  %v442_v35 = vld [vmem:[#allocation6 + $0x58] sm:$0xff]  ;;  %v1264_v36 = vpack.c.bf16 %v532_v33, %v531_v32  ;;  %v533_v38 = vld [vmem:[#allocation9 + $0x60] sm:$0xff]  ;;  %p1673_p7 = pneg %p1672_p1  ;;  %p1678_p11 = scmp.lt.s32.totalorder %s1676_s9, %s1670_s0 }
 0x153   : > { %1229 = vmatpush3.bf16.msra.mxu0 %v1228_v13  ;;  %1254 = vmatprep.subr.bf16.mxu1 %v1774_v0  ;;  %v1240_v37 = vpack.c.bf16 %v442_v35, %v441_v34  ;;  %v534_v39 = vld [vmem:[#allocation9 + $0x68] sm:$0xff]  ;;  %v443_v40 = vld [vmem:[#allocation6 + $0x60] sm:$0xff]  ;;  %v535_v44 = vld [vmem:[#allocation9 + $0x70] sm:$0xff] }
 0x154   : > { %1230 = vmatprep.subr.bf16.mxu0 %v1774_v0  ;;  %v444_v41 = vld [vmem:[#allocation6 + $0x68] sm:$0xff]  ;;  %v1267_v42 = vpack.c.bf16 %v534_v39, %v533_v38  ;;  %v536_v45 = vld [vmem:[#allocation9 + $0x78] sm:$0xff]  ;;  %v445_v46 = vld [vmem:[#allocation6 + $0x70] sm:$0xff]  ;;  %p1679_p0 = por %p1678_p11, %p1677_p10 }
 0x155   : > { %v1243_v43 = vpack.c.bf16 %v444_v41, %v443_v40  ;;  %v446_v47 = vld [vmem:[#allocation6 + $0x78] sm:$0xff]  ;;  %v1270_v48 = vpack.c.bf16 %v536_v45, %v535_v44  ;;  %v614_v60 = vld [vmem:[#allocation11] sm:$0xff]  ;;  %v615_v61 = vld [vmem:[#allocation11 + $0x8] sm:$0xff] }
 0x156   : > { %1256 = vmatpush3.bf16.msra.mxu1 %v1255_v18  ;;  %v1246_v49 = vpack.c.bf16 %v446_v47, %v445_v46  ;;  %v2146_v50 = vld [vmem:[#allocation2] sm:$0xff]  ;;  %v616_v62 = vld [vmem:[#allocation11 + $0x10] sm:$0xff]  ;;  %v1273_v63 = vpack.c.bf16 %v615_v61, %v614_v60  ;;  %v618_v4 = vld [vmem:[#allocation11 + $0x20] sm:$0xff]  ;;  %p1680_p2 = pnand %p1679_p0, %p1673_p7 }
 0x157   : > { %1232 = vmatpush3.bf16.msra.mxu0 %v1231_v19  ;;  %1257 = vmatprep.subr.bf16.mxu1 %v1774_v0  ;;  %v449_v51 = vrot.slane %v2146_v50, 7  ;;  %v1040_v52 = vld [vmem:[%s2236_s5] ss:$0 sm:$0xff]  ;;  %v619_v5 = vld [vmem:[#allocation11 + $0x28] sm:$0xff]  ;;  %v620_v7 = vld [vmem:[#allocation11 + $0x30] sm:$0xff] }
 0x158   : > { %1233 = vmatprep.subr.bf16.mxu0 %v1774_v0  ;;  %v447_v53 = vld [vmem:[%s2234_s3] sm:$0x1]  ;;  %v1279_v6 = vpack.c.bf16 %v619_v5, %v618_v4  ;;  %v623_v10 = vld [vmem:[#allocation11 + $0x48] sm:$0xff]  ;;  %v624_v12 = vld [vmem:[#allocation11 + $0x50] sm:$0xff] }
 0x159   : > { %v617_v2 = vld [vmem:[#allocation11 + $0x18] sm:$0xff]  ;;  %v626_v15 = vld [vmem:[#allocation11 + $0x60] sm:$0xff]  ;;  %v627_v16 = vld [vmem:[#allocation11 + $0x68] sm:$0xff] }
 0x15a   : > { %1259 = vmatpush3.bf16.msra.mxu1 %v1258_v24  ;;  %v1276_v3 = vpack.c.bf16 %v617_v2, %v616_v62  ;;  %v621_v8 = vld [vmem:[#allocation11 + $0x38] sm:$0xff]  ;;  %v1291_v17 = vpack.c.bf16 %v627_v16, %v626_v15  ;;  %v628_v18 = vld [vmem:[#allocation11 + $0x70] sm:$0xff] }
 0x15b   : > { %1235 = vmatpush3.bf16.msra.mxu0 %v1234_v25  ;;  %1260 = vmatprep.subr.bf16.mxu1 %v1774_v0  ;;  %v1282_v9 = vpack.c.bf16 %v621_v8, %v620_v7  ;;  %v625_v13 = vld [vmem:[#allocation11 + $0x58] sm:$0xff] }
 0x15c   : > { %1236 = vmatprep.subr.bf16.mxu0 %v1774_v0  ;;  %v1288_v14 = vpack.c.bf16 %v625_v13, %v624_v12  ;;  %v629_v19 = vld [vmem:[#allocation11 + $0x78] sm:$0xff] }
 0x15d   : > { %v1294_v20 = vpack.c.bf16 %v629_v19, %v628_v18 }
 0x15e   : > { %1262 = vmatpush3.bf16.msra.mxu1 %v1261_v30 }
 0x15f   : > { %1238 = vmatpush3.bf16.msra.mxu0 %v1237_v31  ;;  %1263 = vmatprep.subr.bf16.mxu1 %v1774_v0 }
 0x160   : > { %1239 = vmatprep.subr.bf16.mxu0 %v1774_v0 }
 0x162   : > { %1265 = vmatpush3.bf16.msra.mxu1 %v1264_v36 }
 0x163   : > { %1241 = vmatpush3.bf16.msra.mxu0 %v1240_v37  ;;  %1266 = vmatprep.subr.bf16.mxu1 %v1774_v0 }
 0x164   : > { %1242 = vmatprep.subr.bf16.mxu0 %v1774_v0 }
 0x166   : > { %1268 = vmatpush3.bf16.msra.mxu1 %v1267_v42 }
 0x167   : > { %1244 = vmatpush3.bf16.msra.mxu0 %v1243_v43  ;;  %1269 = vmatprep.subr.bf16.mxu1 %v1774_v0 }
 0x168   : > { %1245 = vmatprep.subr.bf16.mxu0 %v1774_v0 }
 0x16a   : > { %1271 = vmatpush3.bf16.msra.mxu1 %v1270_v48 }
 0x16b   : > { %1247 = vmatpush3.bf16.msra.mxu0 %v1246_v49  ;;  %1214 = vmatprep.subr.mxu1 %v1776_v1 }
 0x16c   : > { %1272 = vmatprep.subr.bf16.mxu0 %v1774_v0 }
 0x16d   : > { %1177 = vmatmul.mubr.f32.vlgmr.msra.gmra.mrb[0].mxu1 %v2146_v50 }
 0x16e   : > { %1142 = vmatmul.mubr.f32.vlgmr.msra.gmra.mrb[0].mxu0 %v449_v51  ;;  %1216 = vmatprep.mubr.msk.f32.mxu1 %vm1775_vm0, %v1776_v1 }
 0x16f   : > { %1211 = vmatprep.mubr.msk.f32.mxu0 %vm1775_vm0, %v1776_v1  ;;  %1274 = vmatpush3.bf16.msra.mxu0 %v1273_v63 }
 0x170   : > { %1275 = vmatprep.subr.bf16.mxu0 %v1774_v0 }
 0x173   : > { %1277 = vmatpush3.bf16.msra.mxu0 %v1276_v3 }
 0x174   : > { %1278 = vmatprep.subr.bf16.mxu0 %v1774_v0 }
 0x177   : > { %1280 = vmatpush3.bf16.msra.mxu0 %v1279_v6 }
 0x178   : > { %1281 = vmatprep.subr.bf16.mxu0 %v1774_v0 }
 0x17b   : > { %1283 = vmatpush3.bf16.msra.mxu0 %v1282_v9 }
 0x17c   : > { %1284 = vmatprep.subr.bf16.mxu0 %v1774_v0 }
 0x240   : > { %v610_v54 = vpop.f32.mrb[0].mxu1 }
 0x241   : > { %v611_v55 = vadd.f32 %v1040_v52, %v610_v54  ;;  %v1178_v56 = vpop.f32.mrb[1].mxu1  ;;  %v517_v57 = vpop.f32.mrb[0].mxu0 }
 0x242   : > { %v518_v58 = vadd.f32 %v517_v57, %v447_v53  ;;  %v1143_v59 = vpop.f32.mrb[1].mxu0 }
 0x243   : > { %1215 = vmatpush3.xpose.msra.mxu1 %v611_v55 }
 0x244   : > { %1219 = vmatprep.subr.mxu1 %v1776_v1 }
 0x246   : > { %1217 = vmatmul.mubr.f32.vlgmr.msra.gmra.mrb[2].mxu1 %v518_v58 }
 0x247   : > { %1221 = vmatprep.mubr.msk.f32.mxu1 %vm1775_vm0, %v1776_v1  ;;  %v622_v1 = vld [vmem:[#allocation11 + $0x40] sm:$0xff] }
 0x248   : > { %v1285_v11 = vpack.c.bf16 %v623_v10, %v622_v1 }
 0x24a   : > { %1286 = vmatpush3.bf16.msra.mxu0 %v1285_v11 }
 0x24b   : > { %1287 = vmatprep.subr.bf16.mxu0 %v1774_v0 }
 0x24e   : > { %1289 = vmatpush3.bf16.msra.mxu0 %v1288_v14 }
 0x24f   : > { %1290 = vmatprep.subr.bf16.mxu0 %v1774_v0 }
 0x252   : > { %1292 = vmatpush3.bf16.msra.mxu0 %v1291_v17 }
 0x253   : > { %1293 = vmatprep.subr.bf16.mxu0 %v1774_v0  ;;  %v1041_v0 = vld [vmem:[%s2238_s7] ss:$0 sm:$0xff] }
 0x256   : > { %1295 = vmatpush3.bf16.msra.mxu0 %v1294_v20 }
 0x259   : > { %1212 = vmatmul.mubr.f32.vlgmr.msra.gmra.mrb[2].mxu0 %v2146_v50 }
 0x319   : > { %v773_v21 = vpop.f32.mrb[2].mxu1 }
 0x31a   : > { %v1218_v22 = vpop.f32.mrb[3].mxu1  ;;  %v778_v23 = vsel %vm777_vm1, %v773_v21, -inf }
 0x31b   : > { %779 = vmax.xlane.f32.xlu0 %v778_v23 }
 0x32c   : > { %v703_v29 = vpop.f32.mrb[2].mxu0 }
 0x32d   : > { %v1213_v30 = vpop.f32.mrb[3].mxu0  ;;  %v704_v31 = vadd.f32 %v1041_v0, %v703_v29 }
 0x32f   : > { %1220 = vmatpush3.msra.mxu1 %v704_v31 }
 0x3a8   : > { %v780_v24 = vpop.xlane.xlu0 %779 }
 0x3a9   : > { %v781_v25 = vsub.f32 %v773_v21, %v780_v24 }
 0x3ab   : > { %v782_v26 = vmul.f32 1.442695, %v781_v25 }
 0x3ad   : > { %1380 = vpow2.f32 %v782_v26 }
 0x3b7   : > { %v1381_v27 = vpop.eup %1380 }
 0x3b8   : > { %v784_v28 = vsel %vm777_vm1, %v1381_v27, 0.0 }
 0x3b9   : > { %785 = vadd.xlane.f32.xlu0 %v784_v28 }
 0x446   : > { %v786_v32 = vpop.xlane.xlu0 %785 }
 0x447   : > { %1382 = vrcp.f32 %v786_v32 }
 0x451   : > { %v1383_v33 = vpop.eup %1382 }
 0x452   : > { %v788_v34 = vmul.f32 %v1383_v33, %v1381_v27 }
 0x454   : > { %1222 = vmatmul.mubr.msk.f32.vlgmr.msra.gmra.mrb[4].mxu1 %vm789_vm2, %v788_v34 }
 0x527   : > { %v859_v35 = vpop.f32.mrb[4].mxu1 }
 0x528   : > { %v860_v36 = vadd.f32 %v859_v35, %v449_v51  ;;  %v1223_v37 = vpop.f32.mrb[5].mxu1 }
 0x52a   : > { %863 = vst [vmem:[%s2125_s21] sm:$0x1] %v860_v36 }
 0x52b   : > { %1683 = shalt.err (!%p1680_p2)
}
 0x52c   : > { %s1684_s4 = scalar_lea.hbm %s2186_s28, 16  ;;  %s1688_s22 = scalar_lea.hbm %s2239_s8, 32 }
 0x52d   : > { %p1685_p4 = scmp.ne.s32.totalorder %s2186_s28, %s1684_s4  ;;  %p1689_p5 = scmp.lt.u32.totalorder %s2186_s28, %s2239_s8 }
 0x52e   : > { %p1690_p3 = scmp.lt.u32.totalorder %s1688_s22, %s1684_s4  ;;  %p1692_p8 = scmp.lt.u32.totalorder %s1684_s4, %s2186_s28 }
 0x52f   : > { %p1686_p9 = pnand %p1685_p4, %p2269_p13 }
 0x530   : > { %p1691_p6 = por %p1690_p3, %p1689_p5 }
 0x531   : > { %p1687_p12 = pneg %p1686_p9 }
 0x532   : > { %p1693_p1 = por %p1692_p8, %p1691_p6 }
 0x534   : > { %p1694_p7 = pnand %p1693_p1, %p1687_p12 }
 0x536   : > { %1697 = shalt.err (!%p1694_p7)
}
 0x537   : > { %1308 = dma.vmem_to_hbm [thread:$0]  (%p2269_p13), %s2188_s6, 16, %s2186_s28, %s865_s29  }
 0x538 PF: > { %s2270_s13 = sld [smem:[#allocation46_spill]]  ;;  %p1330_p10 = scmp.ge.s32.totalorder %s1758_s18, 2 }
 0x539   : > { %s889_s19 = sand.u32 1, %s1746_s15  }
 0x53a   : > { %s890_s30 = scalar_lea.sflag [#allocation8], %s889_s19 }
 0x53e   : > { %p2271_p11 = scmp.ne.s32.totalorder %s2270_s13, 0 }
 0x540   : > { %p1321_p0 = pnand %p1330_p10, %p2271_p11 }
 0x542   : > { %1741 = dma.done.wait (!%p1321_p0), %s890_s30, 16  }
 0x543   : > { %1743 = vsyncadd (!%p1321_p0), %s890_s30, 4294967280  ;;  %s2272_s18 = sld [smem:[#allocation44_spill]]  ;;  %s2273_s12 = sld [smem:[#allocation43_spill]] }
 0x544   : > { %s2274_s17 = sld [smem:[#allocation45_spill]]  ;;  %s2275_s15 = smov %s1750_s16 }
 0x549   : > { %p24_p2 = scmp.ge.s32.totalorder %s2272_s18, 4   ;;  %s2276_s16 = smov %s2273_s12 }
 0x54b   :  { %26 = sbr.rel (!%p24_p2) target bundleno = 18 (0x12), region = 150 }
 0x552   :  { %894 = vsyncpa [#allocation7], 1 }
 0x553   :  { %896 = vsyncpa [#allocation7 + $0x1], 1 }
 0x554   :  { %897 = vsyncpa [#allocation10], 1 }
 0x555   :  { %898 = vsyncpa [#allocation8], 1 }
 0x556   :  { %900 = vsyncpa [#allocation8 + $0x1], 1 }
 0x557   :  { %901 = vsyncmov [#allocation3] }
 0x55a   :  { %s902_s24 = vpop.sfrf %901 }
 0x55b   :  { %p1046_p13 = scmp.ne.s32.totalorder %s902_s24, 0 }
 0x55d   :  { %906 = shalt.err (%p1046_p13)  }
 0x55e   :  { %908 = vsyncmov [#allocation3 + $0x1] }
 0x561   :  { %s909_s11 = vpop.sfrf %908 }
 0x562   :  { %p1047_p4 = scmp.ne.s32.totalorder %s909_s11, 0 }
 0x564   :  { %913 = shalt.err (%p1047_p4)  }
 0x565   :  { %915 = vsyncmov [#allocation3 + $0x2] }
 0x568   :  { %s916_s14 = vpop.sfrf %915 }
 0x569   :  { %p1048_p9 = scmp.ne.s32.totalorder %s916_s14, 0 }
 0x56b   :  { %920 = shalt.err (%p1048_p9)  }
 0x56c   :  { %922 = vsyncmov [#allocation3 + $0x3] }
 0x56f   :  { %s923_s18 = vpop.sfrf %922 }
 0x570   :  { %p1049_p12 = scmp.ne.s32.totalorder %s923_s18, 0 }
 0x572   :  { %927 = shalt.err (%p1049_p12)  }
 0x573   :  { %929 = vsyncmov [#allocation3 + $0x4] }
 0x576   :  { %s930_s1 = vpop.sfrf %929 }
 0x577   :  { %p1050_p5 = scmp.ne.s32.totalorder %s930_s1, 0 }
 0x579   :  { %934 = shalt.err (%p1050_p5)  }
 0x57a   :  { %936 = vsyncmov [#allocation3 + $0x5] }
 0x57d   :  { %s937_s3 = vpop.sfrf %936 }
 0x57e   :  { %p1051_p3 = scmp.ne.s32.totalorder %s937_s3, 0 }
 0x580   :  { %941 = shalt.err (%p1051_p3)  }
 0x581   :  { %943 = vsyncmov [#allocation3 + $0x6] }
 0x584   :  { %s944_s5 = vpop.sfrf %943 }
 0x585   :  { %p1052_p6 = scmp.ne.s32.totalorder %s944_s5, 0 }
 0x587   :  { %948 = shalt.err (%p1052_p6)  }
 0x588   :  { %950 = vsyncmov [#allocation3 + $0x7] }
 0x58b   :  { %s951_s7 = vpop.sfrf %950 }
 0x58c   :  { %p1053_p8 = scmp.ne.s32.totalorder %s951_s7, 0 }
 0x58e   :  { %955 = shalt.err (%p1053_p8)  }

</bundles_post_ra>
